<compile_context>
chip_gen: v7x
topology: tpu7x:2x2x1
jax: 0.10.0
libtpu: 0.0.40
codegen_flags: <defaults>
</compile_context>

<pallas_src>
import math

import jax
import jax.numpy as jnp
from jax.experimental import pallas as pl
from jax.experimental.pallas import tpu as pltpu


# ----------------------------------------------------------------------------
# Pallas kernel: whole forward pass (projection + recurrence + attention).
# All operands are tiny and live fully in VMEM, so there is no grid.
# ----------------------------------------------------------------------------
def lstm_attn_kernel(x_ref,            # (T, Bp, I)    f32  VMEM
                     wih_ref,          # (I, 8H)       f32  VMEM  [W_ih_fwd | W_ih_bwd]
                     b_ref,            # (1, 8H)       f32  VMEM  folded biases, both dirs
                     whh_f_ref,        # (H, 4H)       f32  VMEM  recurrent weight (fwd)
                     whh_b_ref,        # (H, 4H)       f32  VMEM  recurrent weight (bwd)
                     w_attn_ref,       # (2H, 1)       f32  VMEM  attention weight
                     attn_b_ref,       # (1, 1)        f32  SMEM  attention bias scalar
                     o_ref,            # (Bp, 2H)      f32  VMEM  output
                     xg_f_ref,         # (T, Bp, 4H)   f32  VMEM  scratch: x@Wih_f + b_f
                     xg_b_ref,         # (T, Bp, 4H)   f32  VMEM  scratch: x@Wih_b + b_b
                     hseq_f_ref,       # (T, Bp, H)    f32  VMEM  scratch: fwd hidden states
                     hseq_b_ref):      # (T, Bp, H)    f32  VMEM  scratch: bwd hidden states
    T, Bp, I = x_ref.shape
    H = whh_f_ref.shape[0]
    G = 4 * H

    # ---- hoisted input projection: ONE MXU matmul covers both directions ----
    x2 = x_ref[...].reshape(T * Bp, I)                               # (T*Bp, I)
    xg = jnp.dot(x2, wih_ref[...],
                 preferred_element_type=jnp.float32) + b_ref[...]    # (T*Bp, 8H)
    # Split once outside the loop (lane slice; for H=32 this is a 128-lane boundary).
    xg_f_ref[...] = xg[:, :G].reshape(T, Bp, G)
    xg_b_ref[...] = xg[:, G:].reshape(T, Bp, G)

    # ---- loop-invariant recurrent weights, loaded once ----
    whh_f = whh_f_ref[...]                                           # (H, 4H)
    whh_b = whh_b_ref[...]                                           # (H, 4H)

    def activate(gates, c):
        # PyTorch gate order: i, f, g, o
        i_g = jax.nn.sigmoid(gates[:, 0 * H:1 * H])
        f_g = jax.nn.sigmoid(gates[:, 1 * H:2 * H])
        g_g = jnp.tanh(gates[:, 2 * H:3 * H])
        o_g = jax.nn.sigmoid(gates[:, 3 * H:4 * H])
        c_new = f_g * c + i_g * g_g
        h_new = o_g * jnp.tanh(c_new)
        return h_new, c_new

    zeros = jnp.zeros((Bp, H), jnp.float32)

    # ---- fused bidirectional recurrence (fwd step t, bwd step T-1-t) ----
    def body(t, carry):
        h_f, c_f, h_b, c_b = carry
        rt = T - 1 - t
        gates_f = xg_f_ref[t] + jnp.dot(h_f, whh_f,
                                        preferred_element_type=jnp.float32)
        gates_b = xg_b_ref[rt] + jnp.dot(h_b, whh_b,
                                         preferred_element_type=jnp.float32)
        h_f, c_f = activate(gates_f, c_f)
        h_b, c_b = activate(gates_b, c_b)
        hseq_f_ref[t] = h_f        # full (Bp, H) store, no lane-offset sub-slice
        hseq_b_ref[rt] = h_b
        return (h_f, c_f, h_b, c_b)

    jax.lax.fori_loop(0, T, body, (zeros, zeros, zeros, zeros), unroll=True)

    # ---- attention over time + weighted sum + LeakyReLU(0.1) ----
    hs_f = hseq_f_ref[...]                                           # (T, Bp, H)
    hs_b = hseq_b_ref[...]                                           # (T, Bp, H)
    out = jnp.concatenate([hs_f, hs_b], axis=-1)                     # (T, Bp, 2H)

    # logits via a single MXU matmul (no cross-lane reduce)
    logits = jnp.dot(out.reshape(T * Bp, 2 * H), w_attn_ref[...],
                     preferred_element_type=jnp.float32).reshape(T, Bp, 1)
    logits = logits + attn_b_ref[0, 0]

    # softmax over the leading (time) axis -- layout-cheap reductions
    m = jnp.max(logits, axis=0, keepdims=True)                       # (1, Bp, 1)
    e = jnp.exp(logits - m)
    probs = e / jnp.sum(e, axis=0, keepdims=True)                    # (T, Bp, 1)

    ctx = jnp.sum(out * probs, axis=0)                               # (Bp, 2H)
    o_ref[...] = jnp.where(ctx >= 0.0, ctx, 0.1 * ctx)


# ----------------------------------------------------------------------------
# Wrapper
# ----------------------------------------------------------------------------
def lstm_attn_forward(x_btI, params):
    """x_btI: (B, T, I) float32.  Returns (B, 2H) float32."""
    B, T, I = x_btI.shape
    H = params["whh_f"].shape[1] // 4

    # Pad batch up to the f32 sublane tile (8); slice after the kernel.
    Bp = max(8, ((B + 7) // 8) * 8)
    x_tbi = jnp.transpose(x_btI, (1, 0, 2))                          # time-major (T, B, I)
    if Bp != B:
        x_tbi = jnp.pad(x_tbi, ((0, 0), (0, Bp - B), (0, 0)))

    # Fuse both directions' input weights / biases into one wide matmul operand.
    wih = jnp.concatenate([params["wih_f"], params["wih_b"]], axis=1)   # (I, 8H)
    b = jnp.concatenate([params["b_f"], params["b_b"]], axis=1)         # (1, 8H)
    w_attn = params["attn_w"].T                                          # (2H, 1)

    vmem = pl.BlockSpec(memory_space=pltpu.MemorySpace.VMEM)
    smem = pl.BlockSpec(memory_space=pltpu.MemorySpace.SMEM)

    # Advisory cost hint: serial recurrence has high latency but tiny FLOPs.
    flops = int(2 * T * Bp * 4 * H * (I + H) * 2 + 4 * T * Bp * 2 * H
                + 2 * T * Bp * 2 * H)
    transc = int(5 * T * Bp * H * 2 + T * Bp)
    bytes_accessed = int(4 * (x_tbi.size + I * 8 * H + 8 * H
                              + 2 * H * 4 * H + 2 * H + 1 + Bp * 2 * H))

    # TODO(synk): for large B on v7x, add a batch grid with
    # dimension_semantics=("parallel",) so both TensorCores are used; skipped
    # here because the padded batch (8) is a single sublane tile.
    out_pad = pl.pallas_call(
        lstm_attn_kernel,
        out_shape=jax.ShapeDtypeStruct((Bp, 2 * H), jnp.float32),
        in_specs=[vmem,                 # x
                  vmem, vmem,           # fused input projection weight / bias
                  vmem, vmem,           # recurrent weights (fwd, bwd)
                  vmem,                 # attention weight
                  smem],                # attention bias scalar
        out_specs=vmem,
        scratch_shapes=[pltpu.VMEM((T, Bp, 4 * H), jnp.float32),     # xg_f
                        pltpu.VMEM((T, Bp, 4 * H), jnp.float32),     # xg_b
                        pltpu.VMEM((T, Bp, H), jnp.float32),         # hseq_f
                        pltpu.VMEM((T, Bp, H), jnp.float32)],        # hseq_b
        cost_estimate=pl.CostEstimate(flops=flops,
                                      transcendentals=transc,
                                      bytes_accessed=bytes_accessed),
    )(x_tbi, wih, b, params["whh_f"], params["whh_b"], w_attn, params["attn_b"])

    return out_pad[:B]


# ----------------------------------------------------------------------------
# Deterministic parameter initialization (PyTorch-style uniform bounds)
# ----------------------------------------------------------------------------
def init_params(key, input_size, hidden_size):
    H, I = hidden_size, input_size
    k_lstm = 1.0 / math.sqrt(H)
    k_attn = 1.0 / math.sqrt(2 * H)
    ks = jax.random.split(key, 10)

    def u(k, shape, bound):
        return jax.random.uniform(k, shape, jnp.float32, -bound, bound)

    # PyTorch stores W_ih as (4H, I), W_hh as (4H, H); transpose for the kernel.
    wih_f = u(ks[0], (4 * H, I), k_lstm)
    whh_f = u(ks[1], (4 * H, H), k_lstm)
    bih_f = u(ks[2], (4 * H,), k_lstm)
    bhh_f = u(ks[3], (4 * H,), k_lstm)
    wih_b = u(ks[4], (4 * H, I), k_lstm)
    whh_b = u(ks[5], (4 * H, H), k_lstm)
    bih_b = u(ks[6], (4 * H,), k_lstm)
    bhh_b = u(ks[7], (4 * H,), k_lstm)
    attn_w = u(ks[8], (1, 2 * H), k_attn)
    attn_b = u(ks[9], (1, 1), k_attn)

    return {
        "wih_f": wih_f.T, "whh_f": whh_f.T, "b_f": (bih_f + bhh_f)[None, :],
        "wih_b": wih_b.T, "whh_b": whh_b.T, "b_b": (bih_b + bhh_b)[None, :],
        "attn_w": attn_w, "attn_b": attn_b,
    }


# ----------------------------------------------------------------------------
# Pure-JAX reference (mirrors torch semantics) for a correctness check
# ----------------------------------------------------------------------------
def reference_forward(x_btI, params):
    B, T, I = x_btI.shape
    H = params["whh_f"].shape[1] // 4

    def cell(xt, h, c, wih, whh, b):
        gates = xt @ wih + h @ whh + b
        i_g = jax.nn.sigmoid(gates[:, 0 * H:1 * H])
        f_g = jax.nn.sigmoid(gates[:, 1 * H:2 * H])
        g_g = jnp.tanh(gates[:, 2 * H:3 * H])
        o_g = jax.nn.sigmoid(gates[:, 3 * H:4 * H])
        c = f_g * c + i_g * g_g
        h = o_g * jnp.tanh(c)
        return h, c

    x_tbi = jnp.transpose(x_btI, (1, 0, 2))
    zeros = jnp.zeros((B, H), jnp.float32)

    def scan_dir(wih, whh, b, xs):
        def step(carry, xt):
            h, c = carry
            h, c = cell(xt, h, c, wih, whh, b)
            return (h, c), h
        _, hs = jax.lax.scan(step, (zeros, zeros), xs)
        return hs  # (T, B, H)

    h_fwd = scan_dir(params["wih_f"], params["whh_f"], params["b_f"], x_tbi)
    h_bwd = scan_dir(params["wih_b"], params["whh_b"], params["b_b"], x_tbi[::-1])[::-1]
    out = jnp.concatenate([h_fwd, h_bwd], axis=-1)          # (T, B, 2H)
    out_btH = jnp.transpose(out, (1, 0, 2))                  # (B, T, 2H)

    logits = out_btH @ params["attn_w"].T + params["attn_b"][0, 0]   # (B, T, 1)
    probs = jax.nn.softmax(logits, axis=1)
    ctx = jnp.sum(probs * out_btH, axis=1)                   # (B, 2H)
    return jnp.where(ctx >= 0.0, ctx, 0.1 * ctx)


if __name__ == "__main__":
    B, T, INPUT_SIZE, HIDDEN_SIZE = 2, 8, 4, 32

    key = jax.random.PRNGKey(0)
    k_x, k_p = jax.random.split(key)
    x = jax.random.normal(k_x, (B, T, INPUT_SIZE), jnp.float32)
    params = init_params(k_p, INPUT_SIZE, HIDDEN_SIZE)

    y = lstm_attn_forward(x, params)
    y = jax.block_until_ready(y)

    y_ref = reference_forward(x, params)
    assert y.shape == (B, 2 * HIDDEN_SIZE)
    assert jnp.allclose(y, y_ref, atol=1e-5, rtol=1e-4), "mismatch vs JAX reference"

    print("KERNEL_OK")
</pallas_src>

<mosaic_0001>
module attributes {stable_mosaic.version = 11 : i64} {
  func.func @lstm_attn_kernel(%arg0: memref<8x8x4xf32, #tpu.memory_space<vmem>>, %arg1: memref<4x256xf32, #tpu.memory_space<vmem>>, %arg2: memref<1x256xf32, #tpu.memory_space<vmem>>, %arg3: memref<32x128xf32, #tpu.memory_space<vmem>>, %arg4: memref<32x128xf32, #tpu.memory_space<vmem>>, %arg5: memref<64x1xf32, #tpu.memory_space<vmem>>, %arg6: memref<1x1xf32, #tpu.memory_space<smem>>, %arg7: memref<8x64xf32, #tpu.memory_space<vmem>>, %arg8: memref<8x8x128xf32, #tpu.memory_space<vmem>>, %arg9: memref<8x8x128xf32, #tpu.memory_space<vmem>>, %arg10: memref<8x8x32xf32, #tpu.memory_space<vmem>>, %arg11: memref<8x8x32xf32, #tpu.memory_space<vmem>>) attributes {dimension_semantics = [], scalar_prefetch = 0 : i64, scratch_operands = 4 : i64, tpu.core_type = #tpu.core_type<tc>} {
    %c0 = arith.constant 0 : index
    %c0_0 = arith.constant 0 : index
    %c0_1 = arith.constant 0 : index
    %0 = vector.load %arg0[%c0, %c0_0, %c0_1] : memref<8x8x4xf32, #tpu.memory_space<vmem>>, vector<8x8x4xf32>
    %1 = vector.shape_cast %0 : vector<8x8x4xf32> to vector<64x4xf32>
    %c0_2 = arith.constant 0 : index
    %c0_3 = arith.constant 0 : index
    %2 = vector.load %arg1[%c0_2, %c0_3] : memref<4x256xf32, #tpu.memory_space<vmem>>, vector<4x256xf32>
    %cst = arith.constant dense<0.000000e+00> : vector<64x256xf32>
    %3 = tpu.matmul %1, %2, %cst {dimension_numbers = #tpu.dot_dimension_numbers<[1], [0], [0], [1], [0, 0, 1, 1], [], []>} : vector<64x4xf32>, vector<4x256xf32>, vector<64x256xf32> -> vector<64x256xf32>
    %c0_4 = arith.constant 0 : index
    %c0_5 = arith.constant 0 : index
    %4 = vector.load %arg2[%c0_4, %c0_5] : memref<1x256xf32, #tpu.memory_space<vmem>>, vector<1x256xf32>
    %5 = vector.broadcast %4 : vector<1x256xf32> to vector<64x256xf32>
    %6 = arith.addf %3, %5 : vector<64x256xf32>
    %7 = vector.extract_strided_slice %6 {offsets = [0, 0], sizes = [64, 128], strides = [1, 1]} : vector<64x256xf32> to vector<64x128xf32>
    %8 = vector.shape_cast %7 : vector<64x128xf32> to vector<8x8x128xf32>
    %c0_6 = arith.constant 0 : index
    %c0_7 = arith.constant 0 : index
    %c0_8 = arith.constant 0 : index
    %9 = vector.load %arg8[%c0_6, %c0_7, %c0_8] : memref<8x8x128xf32, #tpu.memory_space<vmem>>, vector<8x8x128xf32>
    tpu.vector_store %arg8[%c0_6, %c0_7, %c0_8], %8 {strides = array<i32>} : memref<8x8x128xf32, #tpu.memory_space<vmem>>, vector<8x8x128xf32>,
    %10 = vector.extract_strided_slice %6 {offsets = [0, 128], sizes = [64, 128], strides = [1, 1]} : vector<64x256xf32> to vector<64x128xf32>
    %11 = vector.shape_cast %10 : vector<64x128xf32> to vector<8x8x128xf32>
    %c0_9 = arith.constant 0 : index
    %c0_10 = arith.constant 0 : index
    %c0_11 = arith.constant 0 : index
    %12 = vector.load %arg9[%c0_9, %c0_10, %c0_11] : memref<8x8x128xf32, #tpu.memory_space<vmem>>, vector<8x8x128xf32>
    tpu.vector_store %arg9[%c0_9, %c0_10, %c0_11], %11 {strides = array<i32>} : memref<8x8x128xf32, #tpu.memory_space<vmem>>, vector<8x8x128xf32>,
    %c0_12 = arith.constant 0 : index
    %c0_13 = arith.constant 0 : index
    %13 = vector.load %arg3[%c0_12, %c0_13] : memref<32x128xf32, #tpu.memory_space<vmem>>, vector<32x128xf32>
    %c0_14 = arith.constant 0 : index
    %c0_15 = arith.constant 0 : index
    %14 = vector.load %arg4[%c0_14, %c0_15] : memref<32x128xf32, #tpu.memory_space<vmem>>, vector<32x128xf32>
    %cst_16 = arith.constant 0.000000e+00 : f32
    %15 = vector.broadcast %cst_16 : f32 to vector<8x32xf32>
    %c0_i32 = arith.constant 0 : i32
    %c7_i32 = arith.constant 7 : i32
    %16 = arith.subi %c7_i32, %c0_i32 : i32
    %17 = arith.index_cast %c0_i32 : i32 to index
    %c0_17 = arith.constant 0 : index
    %c0_18 = arith.constant 0 : index
    %18 = vector.load %arg8[%17, %c0_17, %c0_18] : memref<8x8x128xf32, #tpu.memory_space<vmem>>, vector<1x8x128xf32>
    %19 = vector.shape_cast %18 : vector<1x8x128xf32> to vector<8x128xf32>
    %cst_19 = arith.constant dense<0.000000e+00> : vector<8x128xf32>
    %20 = tpu.matmul %15, %13, %cst_19 {dimension_numbers = #tpu.dot_dimension_numbers<[1], [0], [0], [1], [0, 0, 1, 1], [], []>} : vector<8x32xf32>, vector<32x128xf32>, vector<8x128xf32> -> vector<8x128xf32>
    %21 = arith.addf %19, %20 : vector<8x128xf32>
    %22 = arith.index_cast %16 : i32 to index
    %c0_20 = arith.constant 0 : index
    %c0_21 = arith.constant 0 : index
    %23 = vector.load %arg9[%22, %c0_20, %c0_21] : memref<8x8x128xf32, #tpu.memory_space<vmem>>, vector<1x8x128xf32>
    %24 = vector.shape_cast %23 : vector<1x8x128xf32> to vector<8x128xf32>
    %cst_22 = arith.constant dense<0.000000e+00> : vector<8x128xf32>
    %25 = tpu.matmul %15, %14, %cst_22 {dimension_numbers = #tpu.dot_dimension_numbers<[1], [0], [0], [1], [0, 0, 1, 1], [], []>} : vector<8x32xf32>, vector<32x128xf32>, vector<8x128xf32> -> vector<8x128xf32>
    %26 = arith.addf %24, %25 : vector<8x128xf32>
    %27 = vector.extract_strided_slice %21 {offsets = [0, 0], sizes = [8, 32], strides = [1, 1]} : vector<8x128xf32> to vector<8x32xf32>
    %28 = arith.negf %27 : vector<8x32xf32>
    %29 = math.exp %28 : vector<8x32xf32>
    %cst_23 = arith.constant 1.000000e+00 : f32
    %30 = vector.broadcast %cst_23 : f32 to vector<8x32xf32>
    %31 = arith.addf %30, %29 : vector<8x32xf32>
    %32 = arith.divf %30, %31 : vector<8x32xf32>
    %33 = vector.extract_strided_slice %21 {offsets = [0, 32], sizes = [8, 32], strides = [1, 1]} : vector<8x128xf32> to vector<8x32xf32>
    %34 = arith.negf %33 : vector<8x32xf32>
    %35 = math.exp %34 : vector<8x32xf32>
    %cst_24 = arith.constant 1.000000e+00 : f32
    %36 = vector.broadcast %cst_24 : f32 to vector<8x32xf32>
    %37 = arith.addf %36, %35 : vector<8x32xf32>
    %38 = arith.divf %36, %37 : vector<8x32xf32>
    %39 = vector.extract_strided_slice %21 {offsets = [0, 64], sizes = [8, 32], strides = [1, 1]} : vector<8x128xf32> to vector<8x32xf32>
    %40 = math.tanh %39 : vector<8x32xf32>
    %41 = vector.extract_strided_slice %21 {offsets = [0, 96], sizes = [8, 32], strides = [1, 1]} : vector<8x128xf32> to vector<8x32xf32>
    %42 = arith.negf %41 : vector<8x32xf32>
    %43 = math.exp %42 : vector<8x32xf32>
    %cst_25 = arith.constant 1.000000e+00 : f32
    %44 = vector.broadcast %cst_25 : f32 to vector<8x32xf32>
    %45 = arith.addf %44, %43 : vector<8x32xf32>
    %46 = arith.divf %44, %45 : vector<8x32xf32>
    %47 = arith.mulf %38, %15 : vector<8x32xf32>
    %48 = arith.mulf %32, %40 : vector<8x32xf32>
    %49 = arith.addf %47, %48 : vector<8x32xf32>
    %50 = math.tanh %49 : vector<8x32xf32>
    %51 = arith.mulf %46, %50 : vector<8x32xf32>
    %52 = vector.extract_strided_slice %26 {offsets = [0, 0], sizes = [8, 32], strides = [1, 1]} : vector<8x128xf32> to vector<8x32xf32>
    %53 = arith.negf %52 : vector<8x32xf32>
    %54 = math.exp %53 : vector<8x32xf32>
    %cst_26 = arith.constant 1.000000e+00 : f32
    %55 = vector.broadcast %cst_26 : f32 to vector<8x32xf32>
    %56 = arith.addf %55, %54 : vector<8x32xf32>
    %57 = arith.divf %55, %56 : vector<8x32xf32>
    %58 = vector.extract_strided_slice %26 {offsets = [0, 32], sizes = [8, 32], strides = [1, 1]} : vector<8x128xf32> to vector<8x32xf32>
    %59 = arith.negf %58 : vector<8x32xf32>
    %60 = math.exp %59 : vector<8x32xf32>
    %cst_27 = arith.constant 1.000000e+00 : f32
    %61 = vector.broadcast %cst_27 : f32 to vector<8x32xf32>
    %62 = arith.addf %61, %60 : vector<8x32xf32>
    %63 = arith.divf %61, %62 : vector<8x32xf32>
    %64 = vector.extract_strided_slice %26 {offsets = [0, 64], sizes = [8, 32], strides = [1, 1]} : vector<8x128xf32> to vector<8x32xf32>
    %65 = math.tanh %64 : vector<8x32xf32>
    %66 = vector.extract_strided_slice %26 {offsets = [0, 96], sizes = [8, 32], strides = [1, 1]} : vector<8x128xf32> to vector<8x32xf32>
    %67 = arith.negf %66 : vector<8x32xf32>
    %68 = math.exp %67 : vector<8x32xf32>
    %cst_28 = arith.constant 1.000000e+00 : f32
    %69 = vector.broadcast %cst_28 : f32 to vector<8x32xf32>
    %70 = arith.addf %69, %68 : vector<8x32xf32>
    %71 = arith.divf %69, %70 : vector<8x32xf32>
    %72 = arith.mulf %63, %15 : vector<8x32xf32>
    %73 = arith.mulf %57, %65 : vector<8x32xf32>
    %74 = arith.addf %72, %73 : vector<8x32xf32>
    %75 = math.tanh %74 : vector<8x32xf32>
    %76 = arith.mulf %71, %75 : vector<8x32xf32>
    %77 = arith.index_cast %c0_i32 : i32 to index
    %c0_29 = arith.constant 0 : index
    %c0_30 = arith.constant 0 : index
    %78 = vector.load %arg10[%77, %c0_29, %c0_30] : memref<8x8x32xf32, #tpu.memory_space<vmem>>, vector<1x8x32xf32>
    %79 = vector.shape_cast %78 : vector<1x8x32xf32> to vector<8x32xf32>
    %80 = vector.shape_cast %51 : vector<8x32xf32> to vector<1x8x32xf32>
    tpu.vector_store %arg10[%77, %c0_29, %c0_30], %80 {strides = array<i32>} : memref<8x8x32xf32, #tpu.memory_space<vmem>>, vector<1x8x32xf32>,
    %81 = arith.index_cast %16 : i32 to index
    %c0_31 = arith.constant 0 : index
    %c0_32 = arith.constant 0 : index
    %82 = vector.load %arg11[%81, %c0_31, %c0_32] : memref<8x8x32xf32, #tpu.memory_space<vmem>>, vector<1x8x32xf32>
    %83 = vector.shape_cast %82 : vector<1x8x32xf32> to vector<8x32xf32>
    %84 = vector.shape_cast %76 : vector<8x32xf32> to vector<1x8x32xf32>
    tpu.vector_store %arg11[%81, %c0_31, %c0_32], %84 {strides = array<i32>} : memref<8x8x32xf32, #tpu.memory_space<vmem>>, vector<1x8x32xf32>,
    %c1_i32 = arith.constant 1 : i32
    %c7_i32_33 = arith.constant 7 : i32
    %85 = arith.subi %c7_i32_33, %c1_i32 : i32
    %86 = arith.index_cast %c1_i32 : i32 to index
    %c0_34 = arith.constant 0 : index
    %c0_35 = arith.constant 0 : index
    %87 = vector.load %arg8[%86, %c0_34, %c0_35] : memref<8x8x128xf32, #tpu.memory_space<vmem>>, vector<1x8x128xf32>
    %88 = vector.shape_cast %87 : vector<1x8x128xf32> to vector<8x128xf32>
    %cst_36 = arith.constant dense<0.000000e+00> : vector<8x128xf32>
    %89 = tpu.matmul %51, %13, %cst_36 {dimension_numbers = #tpu.dot_dimension_numbers<[1], [0], [0], [1], [0, 0, 1, 1], [], []>} : vector<8x32xf32>, vector<32x128xf32>, vector<8x128xf32> -> vector<8x128xf32>
    %90 = arith.addf %88, %89 : vector<8x128xf32>
    %91 = arith.index_cast %85 : i32 to index
    %c0_37 = arith.constant 0 : index
    %c0_38 = arith.constant 0 : index
    %92 = vector.load %arg9[%91, %c0_37, %c0_38] : memref<8x8x128xf32, #tpu.memory_space<vmem>>, vector<1x8x128xf32>
    %93 = vector.shape_cast %92 : vector<1x8x128xf32> to vector<8x128xf32>
    %cst_39 = arith.constant dense<0.000000e+00> : vector<8x128xf32>
    %94 = tpu.matmul %76, %14, %cst_39 {dimension_numbers = #tpu.dot_dimension_numbers<[1], [0], [0], [1], [0, 0, 1, 1], [], []>} : vector<8x32xf32>, vector<32x128xf32>, vector<8x128xf32> -> vector<8x128xf32>
    %95 = arith.addf %93, %94 : vector<8x128xf32>
    %96 = vector.extract_strided_slice %90 {offsets = [0, 0], sizes = [8, 32], strides = [1, 1]} : vector<8x128xf32> to vector<8x32xf32>
    %97 = arith.negf %96 : vector<8x32xf32>
    %98 = math.exp %97 : vector<8x32xf32>
    %cst_40 = arith.constant 1.000000e+00 : f32
    %99 = vector.broadcast %cst_40 : f32 to vector<8x32xf32>
    %100 = arith.addf %99, %98 : vector<8x32xf32>
    %101 = arith.divf %99, %100 : vector<8x32xf32>
    %102 = vector.extract_strided_slice %90 {offsets = [0, 32], sizes = [8, 32], strides = [1, 1]} : vector<8x128xf32> to vector<8x32xf32>
    %103 = arith.negf %102 : vector<8x32xf32>
    %104 = math.exp %103 : vector<8x32xf32>
    %cst_41 = arith.constant 1.000000e+00 : f32
    %105 = vector.broadcast %cst_41 : f32 to vector<8x32xf32>
    %106 = arith.addf %105, %104 : vector<8x32xf32>
    %107 = arith.divf %105, %106 : vector<8x32xf32>
    %108 = vector.extract_strided_slice %90 {offsets = [0, 64], sizes = [8, 32], strides = [1, 1]} : vector<8x128xf32> to vector<8x32xf32>
    %109 = math.tanh %108 : vector<8x32xf32>
    %110 = vector.extract_strided_slice %90 {offsets = [0, 96], sizes = [8, 32], strides = [1, 1]} : vector<8x128xf32> to vector<8x32xf32>
    %111 = arith.negf %110 : vector<8x32xf32>
    %112 = math.exp %111 : vector<8x32xf32>
    %cst_42 = arith.constant 1.000000e+00 : f32
    %113 = vector.broadcast %cst_42 : f32 to vector<8x32xf32>
    %114 = arith.addf %113, %112 : vector<8x32xf32>
    %115 = arith.divf %113, %114 : vector<8x32xf32>
    %116 = arith.mulf %107, %49 : vector<8x32xf32>
    %117 = arith.mulf %101, %109 : vector<8x32xf32>
    %118 = arith.addf %116, %117 : vector<8x32xf32>
    %119 = math.tanh %118 : vector<8x32xf32>
    %120 = arith.mulf %115, %119 : vector<8x32xf32>
    %121 = vector.extract_strided_slice %95 {offsets = [0, 0], sizes = [8, 32], strides = [1, 1]} : vector<8x128xf32> to vector<8x32xf32>
    %122 = arith.negf %121 : vector<8x32xf32>
    %123 = math.exp %122 : vector<8x32xf32>
    %cst_43 = arith.constant 1.000000e+00 : f32
    %124 = vector.broadcast %cst_43 : f32 to vector<8x32xf32>
    %125 = arith.addf %124, %123 : vector<8x32xf32>
    %126 = arith.divf %124, %125 : vector<8x32xf32>
    %127 = vector.extract_strided_slice %95 {offsets = [0, 32], sizes = [8, 32], strides = [1, 1]} : vector<8x128xf32> to vector<8x32xf32>
    %128 = arith.negf %127 : vector<8x32xf32>
    %129 = math.exp %128 : vector<8x32xf32>
    %cst_44 = arith.constant 1.000000e+00 : f32
    %130 = vector.broadcast %cst_44 : f32 to vector<8x32xf32>
    %131 = arith.addf %130, %129 : vector<8x32xf32>
    %132 = arith.divf %130, %131 : vector<8x32xf32>
    %133 = vector.extract_strided_slice %95 {offsets = [0, 64], sizes = [8, 32], strides = [1, 1]} : vector<8x128xf32> to vector<8x32xf32>
    %134 = math.tanh %133 : vector<8x32xf32>
    %135 = vector.extract_strided_slice %95 {offsets = [0, 96], sizes = [8, 32], strides = [1, 1]} : vector<8x128xf32> to vector<8x32xf32>
    %136 = arith.negf %135 : vector<8x32xf32>
    %137 = math.exp %136 : vector<8x32xf32>
    %cst_45 = arith.constant 1.000000e+00 : f32
    %138 = vector.broadcast %cst_45 : f32 to vector<8x32xf32>
    %139 = arith.addf %138, %137 : vector<8x32xf32>
    %140 = arith.divf %138, %139 : vector<8x32xf32>
    %141 = arith.mulf %132, %74 : vector<8x32xf32>
    %142 = arith.mulf %126, %134 : vector<8x32xf32>
    %143 = arith.addf %141, %142 : vector<8x32xf32>
    %144 = math.tanh %143 : vector<8x32xf32>
    %145 = arith.mulf %140, %144 : vector<8x32xf32>
    %146 = arith.index_cast %c1_i32 : i32 to index
    %c0_46 = arith.constant 0 : index
    %c0_47 = arith.constant 0 : index
    %147 = vector.load %arg10[%146, %c0_46, %c0_47] : memref<8x8x32xf32, #tpu.memory_space<vmem>>, vector<1x8x32xf32>
    %148 = vector.shape_cast %147 : vector<1x8x32xf32> to vector<8x32xf32>
    %149 = vector.shape_cast %120 : vector<8x32xf32> to vector<1x8x32xf32>
    tpu.vector_store %arg10[%146, %c0_46, %c0_47], %149 {strides = array<i32>} : memref<8x8x32xf32, #tpu.memory_space<vmem>>, vector<1x8x32xf32>,
    %150 = arith.index_cast %85 : i32 to index
    %c0_48 = arith.constant 0 : index
    %c0_49 = arith.constant 0 : index
    %151 = vector.load %arg11[%150, %c0_48, %c0_49] : memref<8x8x32xf32, #tpu.memory_space<vmem>>, vector<1x8x32xf32>
    %152 = vector.shape_cast %151 : vector<1x8x32xf32> to vector<8x32xf32>
    %153 = vector.shape_cast %145 : vector<8x32xf32> to vector<1x8x32xf32>
    tpu.vector_store %arg11[%150, %c0_48, %c0_49], %153 {strides = array<i32>} : memref<8x8x32xf32, #tpu.memory_space<vmem>>, vector<1x8x32xf32>,
    %c2_i32 = arith.constant 2 : i32
    %c7_i32_50 = arith.constant 7 : i32
    %154 = arith.subi %c7_i32_50, %c2_i32 : i32
    %155 = arith.index_cast %c2_i32 : i32 to index
    %c0_51 = arith.constant 0 : index
    %c0_52 = arith.constant 0 : index
    %156 = vector.load %arg8[%155, %c0_51, %c0_52] : memref<8x8x128xf32, #tpu.memory_space<vmem>>, vector<1x8x128xf32>
    %157 = vector.shape_cast %156 : vector<1x8x128xf32> to vector<8x128xf32>
    %cst_53 = arith.constant dense<0.000000e+00> : vector<8x128xf32>
    %158 = tpu.matmul %120, %13, %cst_53 {dimension_numbers = #tpu.dot_dimension_numbers<[1], [0], [0], [1], [0, 0, 1, 1], [], []>} : vector<8x32xf32>, vector<32x128xf32>, vector<8x128xf32> -> vector<8x128xf32>
    %159 = arith.addf %157, %158 : vector<8x128xf32>
    %160 = arith.index_cast %154 : i32 to index
    %c0_54 = arith.constant 0 : index
    %c0_55 = arith.constant 0 : index
    %161 = vector.load %arg9[%160, %c0_54, %c0_55] : memref<8x8x128xf32, #tpu.memory_space<vmem>>, vector<1x8x128xf32>
    %162 = vector.shape_cast %161 : vector<1x8x128xf32> to vector<8x128xf32>
    %cst_56 = arith.constant dense<0.000000e+00> : vector<8x128xf32>
    %163 = tpu.matmul %145, %14, %cst_56 {dimension_numbers = #tpu.dot_dimension_numbers<[1], [0], [0], [1], [0, 0, 1, 1], [], []>} : vector<8x32xf32>, vector<32x128xf32>, vector<8x128xf32> -> vector<8x128xf32>
    %164 = arith.addf %162, %163 : vector<8x128xf32>
    %165 = vector.extract_strided_slice %159 {offsets = [0, 0], sizes = [8, 32], strides = [1, 1]} : vector<8x128xf32> to vector<8x32xf32>
    %166 = arith.negf %165 : vector<8x32xf32>
    %167 = math.exp %166 : vector<8x32xf32>
    %cst_57 = arith.constant 1.000000e+00 : f32
    %168 = vector.broadcast %cst_57 : f32 to vector<8x32xf32>
    %169 = arith.addf %168, %167 : vector<8x32xf32>
    %170 = arith.divf %168, %169 : vector<8x32xf32>
    %171 = vector.extract_strided_slice %159 {offsets = [0, 32], sizes = [8, 32], strides = [1, 1]} : vector<8x128xf32> to vector<8x32xf32>
    %172 = arith.negf %171 : vector<8x32xf32>
    %173 = math.exp %172 : vector<8x32xf32>
    %cst_58 = arith.constant 1.000000e+00 : f32
    %174 = vector.broadcast %cst_58 : f32 to vector<8x32xf32>
    %175 = arith.addf %174, %173 : vector<8x32xf32>
    %176 = arith.divf %174, %175 : vector<8x32xf32>
    %177 = vector.extract_strided_slice %159 {offsets = [0, 64], sizes = [8, 32], strides = [1, 1]} : vector<8x128xf32> to vector<8x32xf32>
    %178 = math.tanh %177 : vector<8x32xf32>
    %179 = vector.extract_strided_slice %159 {offsets = [0, 96], sizes = [8, 32], strides = [1, 1]} : vector<8x128xf32> to vector<8x32xf32>
    %180 = arith.negf %179 : vector<8x32xf32>
    %181 = math.exp %180 : vector<8x32xf32>
    %cst_59 = arith.constant 1.000000e+00 : f32
    %182 = vector.broadcast %cst_59 : f32 to vector<8x32xf32>
    %183 = arith.addf %182, %181 : vector<8x32xf32>
    %184 = arith.divf %182, %183 : vector<8x32xf32>
    %185 = arith.mulf %176, %118 : vector<8x32xf32>
    %186 = arith.mulf %170, %178 : vector<8x32xf32>
    %187 = arith.addf %185, %186 : vector<8x32xf32>
    %188 = math.tanh %187 : vector<8x32xf32>
    %189 = arith.mulf %184, %188 : vector<8x32xf32>
    %190 = vector.extract_strided_slice %164 {offsets = [0, 0], sizes = [8, 32], strides = [1, 1]} : vector<8x128xf32> to vector<8x32xf32>
    %191 = arith.negf %190 : vector<8x32xf32>
    %192 = math.exp %191 : vector<8x32xf32>
    %cst_60 = arith.constant 1.000000e+00 : f32
    %193 = vector.broadcast %cst_60 : f32 to vector<8x32xf32>
    %194 = arith.addf %193, %192 : vector<8x32xf32>
    %195 = arith.divf %193, %194 : vector<8x32xf32>
    %196 = vector.extract_strided_slice %164 {offsets = [0, 32], sizes = [8, 32], strides = [1, 1]} : vector<8x128xf32> to vector<8x32xf32>
    %197 = arith.negf %196 : vector<8x32xf32>
    %198 = math.exp %197 : vector<8x32xf32>
    %cst_61 = arith.constant 1.000000e+00 : f32
    %199 = vector.broadcast %cst_61 : f32 to vector<8x32xf32>
    %200 = arith.addf %199, %198 : vector<8x32xf32>
    %201 = arith.divf %199, %200 : vector<8x32xf32>
    %202 = vector.extract_strided_slice %164 {offsets = [0, 64], sizes = [8, 32], strides = [1, 1]} : vector<8x128xf32> to vector<8x32xf32>
    %203 = math.tanh %202 : vector<8x32xf32>
    %204 = vector.extract_strided_slice %164 {offsets = [0, 96], sizes = [8, 32], strides = [1, 1]} : vector<8x128xf32> to vector<8x32xf32>
    %205 = arith.negf %204 : vector<8x32xf32>
    %206 = math.exp %205 : vector<8x32xf32>
    %cst_62 = arith.constant 1.000000e+00 : f32
    %207 = vector.broadcast %cst_62 : f32 to vector<8x32xf32>
    %208 = arith.addf %207, %206 : vector<8x32xf32>
    %209 = arith.divf %207, %208 : vector<8x32xf32>
    %210 = arith.mulf %201, %143 : vector<8x32xf32>
    %211 = arith.mulf %195, %203 : vector<8x32xf32>
    %212 = arith.addf %210, %211 : vector<8x32xf32>
    %213 = math.tanh %212 : vector<8x32xf32>
    %214 = arith.mulf %209, %213 : vector<8x32xf32>
    %215 = arith.index_cast %c2_i32 : i32 to index
    %c0_63 = arith.constant 0 : index
    %c0_64 = arith.constant 0 : index
    %216 = vector.load %arg10[%215, %c0_63, %c0_64] : memref<8x8x32xf32, #tpu.memory_space<vmem>>, vector<1x8x32xf32>
    %217 = vector.shape_cast %216 : vector<1x8x32xf32> to vector<8x32xf32>
    %218 = vector.shape_cast %189 : vector<8x32xf32> to vector<1x8x32xf32>
    tpu.vector_store %arg10[%215, %c0_63, %c0_64], %218 {strides = array<i32>} : memref<8x8x32xf32, #tpu.memory_space<vmem>>, vector<1x8x32xf32>,
    %219 = arith.index_cast %154 : i32 to index
    %c0_65 = arith.constant 0 : index
    %c0_66 = arith.constant 0 : index
    %220 = vector.load %arg11[%219, %c0_65, %c0_66] : memref<8x8x32xf32, #tpu.memory_space<vmem>>, vector<1x8x32xf32>
    %221 = vector.shape_cast %220 : vector<1x8x32xf32> to vector<8x32xf32>
    %222 = vector.shape_cast %214 : vector<8x32xf32> to vector<1x8x32xf32>
    tpu.vector_store %arg11[%219, %c0_65, %c0_66], %222 {strides = array<i32>} : memref<8x8x32xf32, #tpu.memory_space<vmem>>, vector<1x8x32xf32>,
    %c3_i32 = arith.constant 3 : i32
    %c7_i32_67 = arith.constant 7 : i32
    %223 = arith.subi %c7_i32_67, %c3_i32 : i32
    %224 = arith.index_cast %c3_i32 : i32 to index
    %c0_68 = arith.constant 0 : index
    %c0_69 = arith.constant 0 : index
    %225 = vector.load %arg8[%224, %c0_68, %c0_69] : memref<8x8x128xf32, #tpu.memory_space<vmem>>, vector<1x8x128xf32>
    %226 = vector.shape_cast %225 : vector<1x8x128xf32> to vector<8x128xf32>
    %cst_70 = arith.constant dense<0.000000e+00> : vector<8x128xf32>
    %227 = tpu.matmul %189, %13, %cst_70 {dimension_numbers = #tpu.dot_dimension_numbers<[1], [0], [0], [1], [0, 0, 1, 1], [], []>} : vector<8x32xf32>, vector<32x128xf32>, vector<8x128xf32> -> vector<8x128xf32>
    %228 = arith.addf %226, %227 : vector<8x128xf32>
    %229 = arith.index_cast %223 : i32 to index
    %c0_71 = arith.constant 0 : index
    %c0_72 = arith.constant 0 : index
    %230 = vector.load %arg9[%229, %c0_71, %c0_72] : memref<8x8x128xf32, #tpu.memory_space<vmem>>, vector<1x8x128xf32>
    %231 = vector.shape_cast %230 : vector<1x8x128xf32> to vector<8x128xf32>
    %cst_73 = arith.constant dense<0.000000e+00> : vector<8x128xf32>
    %232 = tpu.matmul %214, %14, %cst_73 {dimension_numbers = #tpu.dot_dimension_numbers<[1], [0], [0], [1], [0, 0, 1, 1], [], []>} : vector<8x32xf32>, vector<32x128xf32>, vector<8x128xf32> -> vector<8x128xf32>
    %233 = arith.addf %231, %232 : vector<8x128xf32>
    %234 = vector.extract_strided_slice %228 {offsets = [0, 0], sizes = [8, 32], strides = [1, 1]} : vector<8x128xf32> to vector<8x32xf32>
    %235 = arith.negf %234 : vector<8x32xf32>
    %236 = math.exp %235 : vector<8x32xf32>
    %cst_74 = arith.constant 1.000000e+00 : f32
    %237 = vector.broadcast %cst_74 : f32 to vector<8x32xf32>
    %238 = arith.addf %237, %236 : vector<8x32xf32>
    %239 = arith.divf %237, %238 : vector<8x32xf32>
    %240 = vector.extract_strided_slice %228 {offsets = [0, 32], sizes = [8, 32], strides = [1, 1]} : vector<8x128xf32> to vector<8x32xf32>
    %241 = arith.negf %240 : vector<8x32xf32>
    %242 = math.exp %241 : vector<8x32xf32>
    %cst_75 = arith.constant 1.000000e+00 : f32
    %243 = vector.broadcast %cst_75 : f32 to vector<8x32xf32>
    %244 = arith.addf %243, %242 : vector<8x32xf32>
    %245 = arith.divf %243, %244 : vector<8x32xf32>
    %246 = vector.extract_strided_slice %228 {offsets = [0, 64], sizes = [8, 32], strides = [1, 1]} : vector<8x128xf32> to vector<8x32xf32>
    %247 = math.tanh %246 : vector<8x32xf32>
    %248 = vector.extract_strided_slice %228 {offsets = [0, 96], sizes = [8, 32], strides = [1, 1]} : vector<8x128xf32> to vector<8x32xf32>
    %249 = arith.negf %248 : vector<8x32xf32>
    %250 = math.exp %249 : vector<8x32xf32>
    %cst_76 = arith.constant 1.000000e+00 : f32
    %251 = vector.broadcast %cst_76 : f32 to vector<8x32xf32>
    %252 = arith.addf %251, %250 : vector<8x32xf32>
    %253 = arith.divf %251, %252 : vector<8x32xf32>
    %254 = arith.mulf %245, %187 : vector<8x32xf32>
    %255 = arith.mulf %239, %247 : vector<8x32xf32>
    %256 = arith.addf %254, %255 : vector<8x32xf32>
    %257 = math.tanh %256 : vector<8x32xf32>
    %258 = arith.mulf %253, %257 : vector<8x32xf32>
    %259 = vector.extract_strided_slice %233 {offsets = [0, 0], sizes = [8, 32], strides = [1, 1]} : vector<8x128xf32> to vector<8x32xf32>
    %260 = arith.negf %259 : vector<8x32xf32>
    %261 = math.exp %260 : vector<8x32xf32>
    %cst_77 = arith.constant 1.000000e+00 : f32
    %262 = vector.broadcast %cst_77 : f32 to vector<8x32xf32>
    %263 = arith.addf %262, %261 : vector<8x32xf32>
    %264 = arith.divf %262, %263 : vector<8x32xf32>
    %265 = vector.extract_strided_slice %233 {offsets = [0, 32], sizes = [8, 32], strides = [1, 1]} : vector<8x128xf32> to vector<8x32xf32>
    %266 = arith.negf %265 : vector<8x32xf32>
    %267 = math.exp %266 : vector<8x32xf32>
    %cst_78 = arith.constant 1.000000e+00 : f32
    %268 = vector.broadcast %cst_78 : f32 to vector<8x32xf32>
    %269 = arith.addf %268, %267 : vector<8x32xf32>
    %270 = arith.divf %268, %269 : vector<8x32xf32>
    %271 = vector.extract_strided_slice %233 {offsets = [0, 64], sizes = [8, 32], strides = [1, 1]} : vector<8x128xf32> to vector<8x32xf32>
    %272 = math.tanh %271 : vector<8x32xf32>
    %273 = vector.extract_strided_slice %233 {offsets = [0, 96], sizes = [8, 32], strides = [1, 1]} : vector<8x128xf32> to vector<8x32xf32>
    %274 = arith.negf %273 : vector<8x32xf32>
    %275 = math.exp %274 : vector<8x32xf32>
    %cst_79 = arith.constant 1.000000e+00 : f32
    %276 = vector.broadcast %cst_79 : f32 to vector<8x32xf32>
    %277 = arith.addf %276, %275 : vector<8x32xf32>
    %278 = arith.divf %276, %277 : vector<8x32xf32>
    %279 = arith.mulf %270, %212 : vector<8x32xf32>
    %280 = arith.mulf %264, %272 : vector<8x32xf32>
    %281 = arith.addf %279, %280 : vector<8x32xf32>
    %282 = math.tanh %281 : vector<8x32xf32>
    %283 = arith.mulf %278, %282 : vector<8x32xf32>
    %284 = arith.index_cast %c3_i32 : i32 to index
    %c0_80 = arith.constant 0 : index
    %c0_81 = arith.constant 0 : index
    %285 = vector.load %arg10[%284, %c0_80, %c0_81] : memref<8x8x32xf32, #tpu.memory_space<vmem>>, vector<1x8x32xf32>
    %286 = vector.shape_cast %285 : vector<1x8x32xf32> to vector<8x32xf32>
    %287 = vector.shape_cast %258 : vector<8x32xf32> to vector<1x8x32xf32>
    tpu.vector_store %arg10[%284, %c0_80, %c0_81], %287 {strides = array<i32>} : memref<8x8x32xf32, #tpu.memory_space<vmem>>, vector<1x8x32xf32>,
    %288 = arith.index_cast %223 : i32 to index
    %c0_82 = arith.constant 0 : index
    %c0_83 = arith.constant 0 : index
    %289 = vector.load %arg11[%288, %c0_82, %c0_83] : memref<8x8x32xf32, #tpu.memory_space<vmem>>, vector<1x8x32xf32>
    %290 = vector.shape_cast %289 : vector<1x8x32xf32> to vector<8x32xf32>
    %291 = vector.shape_cast %283 : vector<8x32xf32> to vector<1x8x32xf32>
    tpu.vector_store %arg11[%288, %c0_82, %c0_83], %291 {strides = array<i32>} : memref<8x8x32xf32, #tpu.memory_space<vmem>>, vector<1x8x32xf32>,
    %c4_i32 = arith.constant 4 : i32
    %c7_i32_84 = arith.constant 7 : i32
    %292 = arith.subi %c7_i32_84, %c4_i32 : i32
    %293 = arith.index_cast %c4_i32 : i32 to index
    %c0_85 = arith.constant 0 : index
    %c0_86 = arith.constant 0 : index
    %294 = vector.load %arg8[%293, %c0_85, %c0_86] : memref<8x8x128xf32, #tpu.memory_space<vmem>>, vector<1x8x128xf32>
    %295 = vector.shape_cast %294 : vector<1x8x128xf32> to vector<8x128xf32>
    %cst_87 = arith.constant dense<0.000000e+00> : vector<8x128xf32>
    %296 = tpu.matmul %258, %13, %cst_87 {dimension_numbers = #tpu.dot_dimension_numbers<[1], [0], [0], [1], [0, 0, 1, 1], [], []>} : vector<8x32xf32>, vector<32x128xf32>, vector<8x128xf32> -> vector<8x128xf32>
    %297 = arith.addf %295, %296 : vector<8x128xf32>
    %298 = arith.index_cast %292 : i32 to index
    %c0_88 = arith.constant 0 : index
    %c0_89 = arith.constant 0 : index
    %299 = vector.load %arg9[%298, %c0_88, %c0_89] : memref<8x8x128xf32, #tpu.memory_space<vmem>>, vector<1x8x128xf32>
    %300 = vector.shape_cast %299 : vector<1x8x128xf32> to vector<8x128xf32>
    %cst_90 = arith.constant dense<0.000000e+00> : vector<8x128xf32>
    %301 = tpu.matmul %283, %14, %cst_90 {dimension_numbers = #tpu.dot_dimension_numbers<[1], [0], [0], [1], [0, 0, 1, 1], [], []>} : vector<8x32xf32>, vector<32x128xf32>, vector<8x128xf32> -> vector<8x128xf32>
    %302 = arith.addf %300, %301 : vector<8x128xf32>
    %303 = vector.extract_strided_slice %297 {offsets = [0, 0], sizes = [8, 32], strides = [1, 1]} : vector<8x128xf32> to vector<8x32xf32>
    %304 = arith.negf %303 : vector<8x32xf32>
    %305 = math.exp %304 : vector<8x32xf32>
    %cst_91 = arith.constant 1.000000e+00 : f32
    %306 = vector.broadcast %cst_91 : f32 to vector<8x32xf32>
    %307 = arith.addf %306, %305 : vector<8x32xf32>
    %308 = arith.divf %306, %307 : vector<8x32xf32>
    %309 = vector.extract_strided_slice %297 {offsets = [0, 32], sizes = [8, 32], strides = [1, 1]} : vector<8x128xf32> to vector<8x32xf32>
    %310 = arith.negf %309 : vector<8x32xf32>
    %311 = math.exp %310 : vector<8x32xf32>
    %cst_92 = arith.constant 1.000000e+00 : f32
    %312 = vector.broadcast %cst_92 : f32 to vector<8x32xf32>
    %313 = arith.addf %312, %311 : vector<8x32xf32>
    %314 = arith.divf %312, %313 : vector<8x32xf32>
    %315 = vector.extract_strided_slice %297 {offsets = [0, 64], sizes = [8, 32], strides = [1, 1]} : vector<8x128xf32> to vector<8x32xf32>
    %316 = math.tanh %315 : vector<8x32xf32>
    %317 = vector.extract_strided_slice %297 {offsets = [0, 96], sizes = [8, 32], strides = [1, 1]} : vector<8x128xf32> to vector<8x32xf32>
    %318 = arith.negf %317 : vector<8x32xf32>
    %319 = math.exp %318 : vector<8x32xf32>
    %cst_93 = arith.constant 1.000000e+00 : f32
    %320 = vector.broadcast %cst_93 : f32 to vector<8x32xf32>
    %321 = arith.addf %320, %319 : vector<8x32xf32>
    %322 = arith.divf %320, %321 : vector<8x32xf32>
    %323 = arith.mulf %314, %256 : vector<8x32xf32>
    %324 = arith.mulf %308, %316 : vector<8x32xf32>
    %325 = arith.addf %323, %324 : vector<8x32xf32>
    %326 = math.tanh %325 : vector<8x32xf32>
    %327 = arith.mulf %322, %326 : vector<8x32xf32>
    %328 = vector.extract_strided_slice %302 {offsets = [0, 0], sizes = [8, 32], strides = [1, 1]} : vector<8x128xf32> to vector<8x32xf32>
    %329 = arith.negf %328 : vector<8x32xf32>
    %330 = math.exp %329 : vector<8x32xf32>
    %cst_94 = arith.constant 1.000000e+00 : f32
    %331 = vector.broadcast %cst_94 : f32 to vector<8x32xf32>
    %332 = arith.addf %331, %330 : vector<8x32xf32>
    %333 = arith.divf %331, %332 : vector<8x32xf32>
    %334 = vector.extract_strided_slice %302 {offsets = [0, 32], sizes = [8, 32], strides = [1, 1]} : vector<8x128xf32> to vector<8x32xf32>
    %335 = arith.negf %334 : vector<8x32xf32>
    %336 = math.exp %335 : vector<8x32xf32>
    %cst_95 = arith.constant 1.000000e+00 : f32
    %337 = vector.broadcast %cst_95 : f32 to vector<8x32xf32>
    %338 = arith.addf %337, %336 : vector<8x32xf32>
    %339 = arith.divf %337, %338 : vector<8x32xf32>
    %340 = vector.extract_strided_slice %302 {offsets = [0, 64], sizes = [8, 32], strides = [1, 1]} : vector<8x128xf32> to vector<8x32xf32>
    %341 = math.tanh %340 : vector<8x32xf32>
    %342 = vector.extract_strided_slice %302 {offsets = [0, 96], sizes = [8, 32], strides = [1, 1]} : vector<8x128xf32> to vector<8x32xf32>
    %343 = arith.negf %342 : vector<8x32xf32>
    %344 = math.exp %343 : vector<8x32xf32>
    %cst_96 = arith.constant 1.000000e+00 : f32
    %345 = vector.broadcast %cst_96 : f32 to vector<8x32xf32>
    %346 = arith.addf %345, %344 : vector<8x32xf32>
    %347 = arith.divf %345, %346 : vector<8x32xf32>
    %348 = arith.mulf %339, %281 : vector<8x32xf32>
    %349 = arith.mulf %333, %341 : vector<8x32xf32>
    %350 = arith.addf %348, %349 : vector<8x32xf32>
    %351 = math.tanh %350 : vector<8x32xf32>
    %352 = arith.mulf %347, %351 : vector<8x32xf32>
    %353 = arith.index_cast %c4_i32 : i32 to index
    %c0_97 = arith.constant 0 : index
    %c0_98 = arith.constant 0 : index
    %354 = vector.load %arg10[%353, %c0_97, %c0_98] : memref<8x8x32xf32, #tpu.memory_space<vmem>>, vector<1x8x32xf32>
    %355 = vector.shape_cast %354 : vector<1x8x32xf32> to vector<8x32xf32>
    %356 = vector.shape_cast %327 : vector<8x32xf32> to vector<1x8x32xf32>
    tpu.vector_store %arg10[%353, %c0_97, %c0_98], %356 {strides = array<i32>} : memref<8x8x32xf32, #tpu.memory_space<vmem>>, vector<1x8x32xf32>,
    %357 = arith.index_cast %292 : i32 to index
    %c0_99 = arith.constant 0 : index
    %c0_100 = arith.constant 0 : index
    %358 = vector.load %arg11[%357, %c0_99, %c0_100] : memref<8x8x32xf32, #tpu.memory_space<vmem>>, vector<1x8x32xf32>
    %359 = vector.shape_cast %358 : vector<1x8x32xf32> to vector<8x32xf32>
    %360 = vector.shape_cast %352 : vector<8x32xf32> to vector<1x8x32xf32>
    tpu.vector_store %arg11[%357, %c0_99, %c0_100], %360 {strides = array<i32>} : memref<8x8x32xf32, #tpu.memory_space<vmem>>, vector<1x8x32xf32>,
    %c5_i32 = arith.constant 5 : i32
    %c7_i32_101 = arith.constant 7 : i32
    %361 = arith.subi %c7_i32_101, %c5_i32 : i32
    %362 = arith.index_cast %c5_i32 : i32 to index
    %c0_102 = arith.constant 0 : index
    %c0_103 = arith.constant 0 : index
    %363 = vector.load %arg8[%362, %c0_102, %c0_103] : memref<8x8x128xf32, #tpu.memory_space<vmem>>, vector<1x8x128xf32>
    %364 = vector.shape_cast %363 : vector<1x8x128xf32> to vector<8x128xf32>
    %cst_104 = arith.constant dense<0.000000e+00> : vector<8x128xf32>
    %365 = tpu.matmul %327, %13, %cst_104 {dimension_numbers = #tpu.dot_dimension_numbers<[1], [0], [0], [1], [0, 0, 1, 1], [], []>} : vector<8x32xf32>, vector<32x128xf32>, vector<8x128xf32> -> vector<8x128xf32>
    %366 = arith.addf %364, %365 : vector<8x128xf32>
    %367 = arith.index_cast %361 : i32 to index
    %c0_105 = arith.constant 0 : index
    %c0_106 = arith.constant 0 : index
    %368 = vector.load %arg9[%367, %c0_105, %c0_106] : memref<8x8x128xf32, #tpu.memory_space<vmem>>, vector<1x8x128xf32>
    %369 = vector.shape_cast %368 : vector<1x8x128xf32> to vector<8x128xf32>
    %cst_107 = arith.constant dense<0.000000e+00> : vector<8x128xf32>
    %370 = tpu.matmul %352, %14, %cst_107 {dimension_numbers = #tpu.dot_dimension_numbers<[1], [0], [0], [1], [0, 0, 1, 1], [], []>} : vector<8x32xf32>, vector<32x128xf32>, vector<8x128xf32> -> vector<8x128xf32>
    %371 = arith.addf %369, %370 : vector<8x128xf32>
    %372 = vector.extract_strided_slice %366 {offsets = [0, 0], sizes = [8, 32], strides = [1, 1]} : vector<8x128xf32> to vector<8x32xf32>
    %373 = arith.negf %372 : vector<8x32xf32>
    %374 = math.exp %373 : vector<8x32xf32>
    %cst_108 = arith.constant 1.000000e+00 : f32
    %375 = vector.broadcast %cst_108 : f32 to vector<8x32xf32>
    %376 = arith.addf %375, %374 : vector<8x32xf32>
    %377 = arith.divf %375, %376 : vector<8x32xf32>
    %378 = vector.extract_strided_slice %366 {offsets = [0, 32], sizes = [8, 32], strides = [1, 1]} : vector<8x128xf32> to vector<8x32xf32>
    %379 = arith.negf %378 : vector<8x32xf32>
    %380 = math.exp %379 : vector<8x32xf32>
    %cst_109 = arith.constant 1.000000e+00 : f32
    %381 = vector.broadcast %cst_109 : f32 to vector<8x32xf32>
    %382 = arith.addf %381, %380 : vector<8x32xf32>
    %383 = arith.divf %381, %382 : vector<8x32xf32>
    %384 = vector.extract_strided_slice %366 {offsets = [0, 64], sizes = [8, 32], strides = [1, 1]} : vector<8x128xf32> to vector<8x32xf32>
    %385 = math.tanh %384 : vector<8x32xf32>
    %386 = vector.extract_strided_slice %366 {offsets = [0, 96], sizes = [8, 32], strides = [1, 1]} : vector<8x128xf32> to vector<8x32xf32>
    %387 = arith.negf %386 : vector<8x32xf32>
    %388 = math.exp %387 : vector<8x32xf32>
    %cst_110 = arith.constant 1.000000e+00 : f32
    %389 = vector.broadcast %cst_110 : f32 to vector<8x32xf32>
    %390 = arith.addf %389, %388 : vector<8x32xf32>
    %391 = arith.divf %389, %390 : vector<8x32xf32>
    %392 = arith.mulf %383, %325 : vector<8x32xf32>
    %393 = arith.mulf %377, %385 : vector<8x32xf32>
    %394 = arith.addf %392, %393 : vector<8x32xf32>
    %395 = math.tanh %394 : vector<8x32xf32>
    %396 = arith.mulf %391, %395 : vector<8x32xf32>
    %397 = vector.extract_strided_slice %371 {offsets = [0, 0], sizes = [8, 32], strides = [1, 1]} : vector<8x128xf32> to vector<8x32xf32>
    %398 = arith.negf %397 : vector<8x32xf32>
    %399 = math.exp %398 : vector<8x32xf32>
    %cst_111 = arith.constant 1.000000e+00 : f32
    %400 = vector.broadcast %cst_111 : f32 to vector<8x32xf32>
    %401 = arith.addf %400, %399 : vector<8x32xf32>
    %402 = arith.divf %400, %401 : vector<8x32xf32>
    %403 = vector.extract_strided_slice %371 {offsets = [0, 32], sizes = [8, 32], strides = [1, 1]} : vector<8x128xf32> to vector<8x32xf32>
    %404 = arith.negf %403 : vector<8x32xf32>
    %405 = math.exp %404 : vector<8x32xf32>
    %cst_112 = arith.constant 1.000000e+00 : f32
    %406 = vector.broadcast %cst_112 : f32 to vector<8x32xf32>
    %407 = arith.addf %406, %405 : vector<8x32xf32>
    %408 = arith.divf %406, %407 : vector<8x32xf32>
    %409 = vector.extract_strided_slice %371 {offsets = [0, 64], sizes = [8, 32], strides = [1, 1]} : vector<8x128xf32> to vector<8x32xf32>
    %410 = math.tanh %409 : vector<8x32xf32>
    %411 = vector.extract_strided_slice %371 {offsets = [0, 96], sizes = [8, 32], strides = [1, 1]} : vector<8x128xf32> to vector<8x32xf32>
    %412 = arith.negf %411 : vector<8x32xf32>
    %413 = math.exp %412 : vector<8x32xf32>
    %cst_113 = arith.constant 1.000000e+00 : f32
    %414 = vector.broadcast %cst_113 : f32 to vector<8x32xf32>
    %415 = arith.addf %414, %413 : vector<8x32xf32>
    %416 = arith.divf %414, %415 : vector<8x32xf32>
    %417 = arith.mulf %408, %350 : vector<8x32xf32>
    %418 = arith.mulf %402, %410 : vector<8x32xf32>
    %419 = arith.addf %417, %418 : vector<8x32xf32>
    %420 = math.tanh %419 : vector<8x32xf32>
    %421 = arith.mulf %416, %420 : vector<8x32xf32>
    %422 = arith.index_cast %c5_i32 : i32 to index
    %c0_114 = arith.constant 0 : index
    %c0_115 = arith.constant 0 : index
    %423 = vector.load %arg10[%422, %c0_114, %c0_115] : memref<8x8x32xf32, #tpu.memory_space<vmem>>, vector<1x8x32xf32>
    %424 = vector.shape_cast %423 : vector<1x8x32xf32> to vector<8x32xf32>
    %425 = vector.shape_cast %396 : vector<8x32xf32> to vector<1x8x32xf32>
    tpu.vector_store %arg10[%422, %c0_114, %c0_115], %425 {strides = array<i32>} : memref<8x8x32xf32, #tpu.memory_space<vmem>>, vector<1x8x32xf32>,
    %426 = arith.index_cast %361 : i32 to index
    %c0_116 = arith.constant 0 : index
    %c0_117 = arith.constant 0 : index
    %427 = vector.load %arg11[%426, %c0_116, %c0_117] : memref<8x8x32xf32, #tpu.memory_space<vmem>>, vector<1x8x32xf32>
    %428 = vector.shape_cast %427 : vector<1x8x32xf32> to vector<8x32xf32>
    %429 = vector.shape_cast %421 : vector<8x32xf32> to vector<1x8x32xf32>
    tpu.vector_store %arg11[%426, %c0_116, %c0_117], %429 {strides = array<i32>} : memref<8x8x32xf32, #tpu.memory_space<vmem>>, vector<1x8x32xf32>,
    %c6_i32 = arith.constant 6 : i32
    %c7_i32_118 = arith.constant 7 : i32
    %430 = arith.subi %c7_i32_118, %c6_i32 : i32
    %431 = arith.index_cast %c6_i32 : i32 to index
    %c0_119 = arith.constant 0 : index
    %c0_120 = arith.constant 0 : index
    %432 = vector.load %arg8[%431, %c0_119, %c0_120] : memref<8x8x128xf32, #tpu.memory_space<vmem>>, vector<1x8x128xf32>
    %433 = vector.shape_cast %432 : vector<1x8x128xf32> to vector<8x128xf32>
    %cst_121 = arith.constant dense<0.000000e+00> : vector<8x128xf32>
    %434 = tpu.matmul %396, %13, %cst_121 {dimension_numbers = #tpu.dot_dimension_numbers<[1], [0], [0], [1], [0, 0, 1, 1], [], []>} : vector<8x32xf32>, vector<32x128xf32>, vector<8x128xf32> -> vector<8x128xf32>
    %435 = arith.addf %433, %434 : vector<8x128xf32>
    %436 = arith.index_cast %430 : i32 to index
    %c0_122 = arith.constant 0 : index
    %c0_123 = arith.constant 0 : index
    %437 = vector.load %arg9[%436, %c0_122, %c0_123] : memref<8x8x128xf32, #tpu.memory_space<vmem>>, vector<1x8x128xf32>
    %438 = vector.shape_cast %437 : vector<1x8x128xf32> to vector<8x128xf32>
    %cst_124 = arith.constant dense<0.000000e+00> : vector<8x128xf32>
    %439 = tpu.matmul %421, %14, %cst_124 {dimension_numbers = #tpu.dot_dimension_numbers<[1], [0], [0], [1], [0, 0, 1, 1], [], []>} : vector<8x32xf32>, vector<32x128xf32>, vector<8x128xf32> -> vector<8x128xf32>
    %440 = arith.addf %438, %439 : vector<8x128xf32>
    %441 = vector.extract_strided_slice %435 {offsets = [0, 0], sizes = [8, 32], strides = [1, 1]} : vector<8x128xf32> to vector<8x32xf32>
    %442 = arith.negf %441 : vector<8x32xf32>
    %443 = math.exp %442 : vector<8x32xf32>
    %cst_125 = arith.constant 1.000000e+00 : f32
    %444 = vector.broadcast %cst_125 : f32 to vector<8x32xf32>
    %445 = arith.addf %444, %443 : vector<8x32xf32>
    %446 = arith.divf %444, %445 : vector<8x32xf32>
    %447 = vector.extract_strided_slice %435 {offsets = [0, 32], sizes = [8, 32], strides = [1, 1]} : vector<8x128xf32> to vector<8x32xf32>
    %448 = arith.negf %447 : vector<8x32xf32>
    %449 = math.exp %448 : vector<8x32xf32>
    %cst_126 = arith.constant 1.000000e+00 : f32
    %450 = vector.broadcast %cst_126 : f32 to vector<8x32xf32>
    %451 = arith.addf %450, %449 : vector<8x32xf32>
    %452 = arith.divf %450, %451 : vector<8x32xf32>
    %453 = vector.extract_strided_slice %435 {offsets = [0, 64], sizes = [8, 32], strides = [1, 1]} : vector<8x128xf32> to vector<8x32xf32>
    %454 = math.tanh %453 : vector<8x32xf32>
    %455 = vector.extract_strided_slice %435 {offsets = [0, 96], sizes = [8, 32], strides = [1, 1]} : vector<8x128xf32> to vector<8x32xf32>
    %456 = arith.negf %455 : vector<8x32xf32>
    %457 = math.exp %456 : vector<8x32xf32>
    %cst_127 = arith.constant 1.000000e+00 : f32
    %458 = vector.broadcast %cst_127 : f32 to vector<8x32xf32>
    %459 = arith.addf %458, %457 : vector<8x32xf32>
    %460 = arith.divf %458, %459 : vector<8x32xf32>
    %461 = arith.mulf %452, %394 : vector<8x32xf32>
    %462 = arith.mulf %446, %454 : vector<8x32xf32>
    %463 = arith.addf %461, %462 : vector<8x32xf32>
    %464 = math.tanh %463 : vector<8x32xf32>
    %465 = arith.mulf %460, %464 : vector<8x32xf32>
    %466 = vector.extract_strided_slice %440 {offsets = [0, 0], sizes = [8, 32], strides = [1, 1]} : vector<8x128xf32> to vector<8x32xf32>
    %467 = arith.negf %466 : vector<8x32xf32>
    %468 = math.exp %467 : vector<8x32xf32>
    %cst_128 = arith.constant 1.000000e+00 : f32
    %469 = vector.broadcast %cst_128 : f32 to vector<8x32xf32>
    %470 = arith.addf %469, %468 : vector<8x32xf32>
    %471 = arith.divf %469, %470 : vector<8x32xf32>
    %472 = vector.extract_strided_slice %440 {offsets = [0, 32], sizes = [8, 32], strides = [1, 1]} : vector<8x128xf32> to vector<8x32xf32>
    %473 = arith.negf %472 : vector<8x32xf32>
    %474 = math.exp %473 : vector<8x32xf32>
    %cst_129 = arith.constant 1.000000e+00 : f32
    %475 = vector.broadcast %cst_129 : f32 to vector<8x32xf32>
    %476 = arith.addf %475, %474 : vector<8x32xf32>
    %477 = arith.divf %475, %476 : vector<8x32xf32>
    %478 = vector.extract_strided_slice %440 {offsets = [0, 64], sizes = [8, 32], strides = [1, 1]} : vector<8x128xf32> to vector<8x32xf32>
    %479 = math.tanh %478 : vector<8x32xf32>
    %480 = vector.extract_strided_slice %440 {offsets = [0, 96], sizes = [8, 32], strides = [1, 1]} : vector<8x128xf32> to vector<8x32xf32>
    %481 = arith.negf %480 : vector<8x32xf32>
    %482 = math.exp %481 : vector<8x32xf32>
    %cst_130 = arith.constant 1.000000e+00 : f32
    %483 = vector.broadcast %cst_130 : f32 to vector<8x32xf32>
    %484 = arith.addf %483, %482 : vector<8x32xf32>
    %485 = arith.divf %483, %484 : vector<8x32xf32>
    %486 = arith.mulf %477, %419 : vector<8x32xf32>
    %487 = arith.mulf %471, %479 : vector<8x32xf32>
    %488 = arith.addf %486, %487 : vector<8x32xf32>
    %489 = math.tanh %488 : vector<8x32xf32>
    %490 = arith.mulf %485, %489 : vector<8x32xf32>
    %491 = arith.index_cast %c6_i32 : i32 to index
    %c0_131 = arith.constant 0 : index
    %c0_132 = arith.constant 0 : index
    %492 = vector.load %arg10[%491, %c0_131, %c0_132] : memref<8x8x32xf32, #tpu.memory_space<vmem>>, vector<1x8x32xf32>
    %493 = vector.shape_cast %492 : vector<1x8x32xf32> to vector<8x32xf32>
    %494 = vector.shape_cast %465 : vector<8x32xf32> to vector<1x8x32xf32>
    tpu.vector_store %arg10[%491, %c0_131, %c0_132], %494 {strides = array<i32>} : memref<8x8x32xf32, #tpu.memory_space<vmem>>, vector<1x8x32xf32>,
    %495 = arith.index_cast %430 : i32 to index
    %c0_133 = arith.constant 0 : index
    %c0_134 = arith.constant 0 : index
    %496 = vector.load %arg11[%495, %c0_133, %c0_134] : memref<8x8x32xf32, #tpu.memory_space<vmem>>, vector<1x8x32xf32>
    %497 = vector.shape_cast %496 : vector<1x8x32xf32> to vector<8x32xf32>
    %498 = vector.shape_cast %490 : vector<8x32xf32> to vector<1x8x32xf32>
    tpu.vector_store %arg11[%495, %c0_133, %c0_134], %498 {strides = array<i32>} : memref<8x8x32xf32, #tpu.memory_space<vmem>>, vector<1x8x32xf32>,
    %c7_i32_135 = arith.constant 7 : i32
    %c7_i32_136 = arith.constant 7 : i32
    %499 = arith.subi %c7_i32_136, %c7_i32_135 : i32
    %500 = arith.index_cast %c7_i32_135 : i32 to index
    %c0_137 = arith.constant 0 : index
    %c0_138 = arith.constant 0 : index
    %501 = vector.load %arg8[%500, %c0_137, %c0_138] : memref<8x8x128xf32, #tpu.memory_space<vmem>>, vector<1x8x128xf32>
    %502 = vector.shape_cast %501 : vector<1x8x128xf32> to vector<8x128xf32>
    %cst_139 = arith.constant dense<0.000000e+00> : vector<8x128xf32>
    %503 = tpu.matmul %465, %13, %cst_139 {dimension_numbers = #tpu.dot_dimension_numbers<[1], [0], [0], [1], [0, 0, 1, 1], [], []>} : vector<8x32xf32>, vector<32x128xf32>, vector<8x128xf32> -> vector<8x128xf32>
    %504 = arith.addf %502, %503 : vector<8x128xf32>
    %505 = arith.index_cast %499 : i32 to index
    %c0_140 = arith.constant 0 : index
    %c0_141 = arith.constant 0 : index
    %506 = vector.load %arg9[%505, %c0_140, %c0_141] : memref<8x8x128xf32, #tpu.memory_space<vmem>>, vector<1x8x128xf32>
    %507 = vector.shape_cast %506 : vector<1x8x128xf32> to vector<8x128xf32>
    %cst_142 = arith.constant dense<0.000000e+00> : vector<8x128xf32>
    %508 = tpu.matmul %490, %14, %cst_142 {dimension_numbers = #tpu.dot_dimension_numbers<[1], [0], [0], [1], [0, 0, 1, 1], [], []>} : vector<8x32xf32>, vector<32x128xf32>, vector<8x128xf32> -> vector<8x128xf32>
    %509 = arith.addf %507, %508 : vector<8x128xf32>
    %510 = vector.extract_strided_slice %504 {offsets = [0, 0], sizes = [8, 32], strides = [1, 1]} : vector<8x128xf32> to vector<8x32xf32>
    %511 = arith.negf %510 : vector<8x32xf32>
    %512 = math.exp %511 : vector<8x32xf32>
    %cst_143 = arith.constant 1.000000e+00 : f32
    %513 = vector.broadcast %cst_143 : f32 to vector<8x32xf32>
    %514 = arith.addf %513, %512 : vector<8x32xf32>
    %515 = arith.divf %513, %514 : vector<8x32xf32>
    %516 = vector.extract_strided_slice %504 {offsets = [0, 32], sizes = [8, 32], strides = [1, 1]} : vector<8x128xf32> to vector<8x32xf32>
    %517 = arith.negf %516 : vector<8x32xf32>
    %518 = math.exp %517 : vector<8x32xf32>
    %cst_144 = arith.constant 1.000000e+00 : f32
    %519 = vector.broadcast %cst_144 : f32 to vector<8x32xf32>
    %520 = arith.addf %519, %518 : vector<8x32xf32>
    %521 = arith.divf %519, %520 : vector<8x32xf32>
    %522 = vector.extract_strided_slice %504 {offsets = [0, 64], sizes = [8, 32], strides = [1, 1]} : vector<8x128xf32> to vector<8x32xf32>
    %523 = math.tanh %522 : vector<8x32xf32>
    %524 = vector.extract_strided_slice %504 {offsets = [0, 96], sizes = [8, 32], strides = [1, 1]} : vector<8x128xf32> to vector<8x32xf32>
    %525 = arith.negf %524 : vector<8x32xf32>
    %526 = math.exp %525 : vector<8x32xf32>
    %cst_145 = arith.constant 1.000000e+00 : f32
    %527 = vector.broadcast %cst_145 : f32 to vector<8x32xf32>
    %528 = arith.addf %527, %526 : vector<8x32xf32>
    %529 = arith.divf %527, %528 : vector<8x32xf32>
    %530 = arith.mulf %521, %463 : vector<8x32xf32>
    %531 = arith.mulf %515, %523 : vector<8x32xf32>
    %532 = arith.addf %530, %531 : vector<8x32xf32>
    %533 = math.tanh %532 : vector<8x32xf32>
    %534 = arith.mulf %529, %533 : vector<8x32xf32>
    %535 = vector.extract_strided_slice %509 {offsets = [0, 0], sizes = [8, 32], strides = [1, 1]} : vector<8x128xf32> to vector<8x32xf32>
    %536 = arith.negf %535 : vector<8x32xf32>
    %537 = math.exp %536 : vector<8x32xf32>
    %cst_146 = arith.constant 1.000000e+00 : f32
    %538 = vector.broadcast %cst_146 : f32 to vector<8x32xf32>
    %539 = arith.addf %538, %537 : vector<8x32xf32>
    %540 = arith.divf %538, %539 : vector<8x32xf32>
    %541 = vector.extract_strided_slice %509 {offsets = [0, 32], sizes = [8, 32], strides = [1, 1]} : vector<8x128xf32> to vector<8x32xf32>
    %542 = arith.negf %541 : vector<8x32xf32>
    %543 = math.exp %542 : vector<8x32xf32>
    %cst_147 = arith.constant 1.000000e+00 : f32
    %544 = vector.broadcast %cst_147 : f32 to vector<8x32xf32>
    %545 = arith.addf %544, %543 : vector<8x32xf32>
    %546 = arith.divf %544, %545 : vector<8x32xf32>
    %547 = vector.extract_strided_slice %509 {offsets = [0, 64], sizes = [8, 32], strides = [1, 1]} : vector<8x128xf32> to vector<8x32xf32>
    %548 = math.tanh %547 : vector<8x32xf32>
    %549 = vector.extract_strided_slice %509 {offsets = [0, 96], sizes = [8, 32], strides = [1, 1]} : vector<8x128xf32> to vector<8x32xf32>
    %550 = arith.negf %549 : vector<8x32xf32>
    %551 = math.exp %550 : vector<8x32xf32>
    %cst_148 = arith.constant 1.000000e+00 : f32
    %552 = vector.broadcast %cst_148 : f32 to vector<8x32xf32>
    %553 = arith.addf %552, %551 : vector<8x32xf32>
    %554 = arith.divf %552, %553 : vector<8x32xf32>
    %555 = arith.mulf %546, %488 : vector<8x32xf32>
    %556 = arith.mulf %540, %548 : vector<8x32xf32>
    %557 = arith.addf %555, %556 : vector<8x32xf32>
    %558 = math.tanh %557 : vector<8x32xf32>
    %559 = arith.mulf %554, %558 : vector<8x32xf32>
    %560 = arith.index_cast %c7_i32_135 : i32 to index
    %c0_149 = arith.constant 0 : index
    %c0_150 = arith.constant 0 : index
    %561 = vector.load %arg10[%560, %c0_149, %c0_150] : memref<8x8x32xf32, #tpu.memory_space<vmem>>, vector<1x8x32xf32>
    %562 = vector.shape_cast %561 : vector<1x8x32xf32> to vector<8x32xf32>
    %563 = vector.shape_cast %534 : vector<8x32xf32> to vector<1x8x32xf32>
    tpu.vector_store %arg10[%560, %c0_149, %c0_150], %563 {strides = array<i32>} : memref<8x8x32xf32, #tpu.memory_space<vmem>>, vector<1x8x32xf32>,
    %564 = arith.index_cast %499 : i32 to index
    %c0_151 = arith.constant 0 : index
    %c0_152 = arith.constant 0 : index
    %565 = vector.load %arg11[%564, %c0_151, %c0_152] : memref<8x8x32xf32, #tpu.memory_space<vmem>>, vector<1x8x32xf32>
    %566 = vector.shape_cast %565 : vector<1x8x32xf32> to vector<8x32xf32>
    %567 = vector.shape_cast %559 : vector<8x32xf32> to vector<1x8x32xf32>
    tpu.vector_store %arg11[%564, %c0_151, %c0_152], %567 {strides = array<i32>} : memref<8x8x32xf32, #tpu.memory_space<vmem>>, vector<1x8x32xf32>,
    %c8_i32 = arith.constant 8 : i32
    %c0_153 = arith.constant 0 : index
    %c0_154 = arith.constant 0 : index
    %c0_155 = arith.constant 0 : index
    %568 = vector.load %arg10[%c0_153, %c0_154, %c0_155] : memref<8x8x32xf32, #tpu.memory_space<vmem>>, vector<8x8x32xf32>
    %c0_156 = arith.constant 0 : index
    %c0_157 = arith.constant 0 : index
    %c0_158 = arith.constant 0 : index
    %569 = vector.load %arg11[%c0_156, %c0_157, %c0_158] : memref<8x8x32xf32, #tpu.memory_space<vmem>>, vector<8x8x32xf32>
    %570 = tpu.concatenate %568, %569 in 2 : vector<8x8x32xf32>, vector<8x8x32xf32> -> vector<8x8x64xf32>
    %571 = vector.shape_cast %570 : vector<8x8x64xf32> to vector<64x64xf32>
    %c0_159 = arith.constant 0 : index
    %c0_160 = arith.constant 0 : index
    %572 = vector.load %arg5[%c0_159, %c0_160] : memref<64x1xf32, #tpu.memory_space<vmem>>, vector<64x1xf32>
    %cst_161 = arith.constant dense<0.000000e+00> : vector<64x1xf32>
    %573 = tpu.matmul %571, %572, %cst_161 {dimension_numbers = #tpu.dot_dimension_numbers<[1], [0], [0], [1], [0, 0, 1, 1], [], []>} : vector<64x64xf32>, vector<64x1xf32>, vector<64x1xf32> -> vector<64x1xf32>
    %574 = vector.shape_cast %573 : vector<64x1xf32> to vector<8x8x1xf32>
    %c0_162 = arith.constant 0 : index
    %c0_163 = arith.constant 0 : index
    %575 = memref.load %arg6[%c0_162, %c0_163] : memref<1x1xf32, #tpu.memory_space<smem>>
    %576 = vector.broadcast %575 : f32 to vector<8x8x1xf32>
    %577 = arith.addf %574, %576 : vector<8x8x1xf32>
    %cst_164 = arith.constant dense<0xFF800000> : vector<8x1xf32>
    %578 = vector.multi_reduction <maximumf>, %577, %cst_164 [0] : vector<8x8x1xf32> to vector<8x1xf32>
    %579 = vector.shape_cast %578 : vector<8x1xf32> to vector<1x8x1xf32>
    %580 = vector.broadcast %579 : vector<1x8x1xf32> to vector<8x8x1xf32>
    %581 = arith.subf %577, %580 : vector<8x8x1xf32>
    %582 = math.exp %581 : vector<8x8x1xf32>
    %cst_165 = arith.constant dense<0.000000e+00> : vector<8x1xf32>
    %583 = vector.multi_reduction <add>, %582, %cst_165 [0] : vector<8x8x1xf32> to vector<8x1xf32>
    %584 = vector.shape_cast %583 : vector<8x1xf32> to vector<1x8x1xf32>
    %585 = vector.broadcast %584 : vector<1x8x1xf32> to vector<8x8x1xf32>
    %586 = arith.divf %582, %585 : vector<8x8x1xf32>
    %587 = vector.broadcast %586 : vector<8x8x1xf32> to vector<8x8x64xf32>
    %588 = arith.mulf %570, %587 : vector<8x8x64xf32>
    %cst_166 = arith.constant dense<0.000000e+00> : vector<8x64xf32>
    %589 = vector.multi_reduction <add>, %588, %cst_166 [0] : vector<8x8x64xf32> to vector<8x64xf32>
    %cst_167 = arith.constant 0.000000e+00 : f32
    %590 = vector.broadcast %cst_167 : f32 to vector<8x64xf32>
    %591 = arith.cmpf oge, %589, %590 : vector<8x64xf32>
    %cst_168 = arith.constant 1.000000e-01 : f32
    %592 = vector.broadcast %cst_168 : f32 to vector<8x64xf32>
    %593 = arith.mulf %592, %589 : vector<8x64xf32>
    %594 = arith.select %591, %589, %593 : vector<8x64xi1>, vector<8x64xf32>
    %c0_169 = arith.constant 0 : index
    %c0_170 = arith.constant 0 : index
    %595 = vector.load %arg7[%c0_169, %c0_170] : memref<8x64xf32, #tpu.memory_space<vmem>>, vector<8x64xf32>
    tpu.vector_store %arg7[%c0_169, %c0_170], %594 {strides = array<i32>} : memref<8x64xf32, #tpu.memory_space<vmem>>, vector<8x64xf32>,
    return
  }
}

</mosaic_0001>

<bundles_post_ra>
// kernel: tpu_custom_call.1
= control target key start
LH: loop header
LB: loop body
LE: loop exit
PB: predicated region body
PF: predicated region fallthrough
CT: control target
= control target key end

     0   :  { %vm76_vm0 = vcmask 1043456   ;;  %v2885_v2 = vmov 0.0   ;;  %vm51_vm1 = vcmask 31744   ;;  %v2886_v10 = vmov 0.0|0.0   ;;  %s3418_s0 = inlined_call_operand.vmem [shape: f32[8,8,4], index: 0, kind: input, shape index: {}]   ;;  %s3419_s1 = inlined_call_operand.vmem [shape: f32[4,256], index: 1, kind: input, shape index: {}]   ;;  %s3420_s2 = inlined_call_operand.vmem [shape: f32[1,256], index: 2, kind: input, shape index: {}]   ;;  %s3421_s3 = inlined_call_operand.vmem [shape: f32[32,128], index: 3, kind: input, shape index: {}]   ;;  %s3422_s4 = inlined_call_operand.vmem [shape: f32[32,128], index: 4, kind: input, shape index: {}]   ;;  %s3423_s5 = inlined_call_operand.vmem [shape: f32[64,1], index: 5, kind: input, shape index: {}]   ;;  %s3424_s6 = inlined_call_operand.<no memory space> [shape: f32[1,1], index: 6, kind: input, shape index: {}]   ;;  %s3425_s7 = inlined_call_operand.hbm [shape: f32[8,64], index: 7, kind: output, shape index: {}]  }
   0x1   :  { %v36_v0 = vld [vmem:[%s3419_s1] sm:$0xff]  ;;  %175 = vmatprep.mubr.f32.mxu1 %v2885_v2  ;;  %v211_v4 = vld [vmem:[%s3421_s3 + $0x8] sm:$0xff]  ;;  %145 = vmatprep.mubr.f32.mxu0 %v2885_v2  ;;  %v212_v7 = vld [vmem:[%s3421_s3 + $0x10] sm:$0xff] }
   0x2   :  { %v50_v1 = vcombine.high %v36_v0, %v36_v0  ;;  %v210_v3 = vld [vmem:[%s3421_s3] sm:$0xff]  ;;  %v33_v5 = vld [vmem:[%s3418_s0 + $0x28] sm:$0xff]  ;;  %v213_v8 = vld [vmem:[%s3421_s3 + $0x18] sm:$0xff] }
   0x3   :  { %v2946_v6 = vpack.c.bf16 %v211_v4, %v210_v3  ;;  %v28_v9 = vld [vmem:[%s3418_s0] sm:$0xff] }
   0x4   :  { %2703 = vmatprep.subr.msk.mxu1 %vm76_vm0, %v50_v1  ;;  %2243 = vmatprep.subr.msk.mxu0 %vm76_vm0, %v50_v1 }
   0x5   :  { %2704 = vmatpush1.msk.msra.mxu1 %vm76_vm0, %v36_v0  ;;  %2244 = vmatpush1.msk.msra.mxu0 %vm76_vm0, %v36_v0 }
   0x6   :  { %2250 = vmatmul.mubr.msk.f32.vlgmr.msra.gmra.mrb[0].mxu1 %vm51_vm1, %v33_v5  ;;  %2591 = vmatprep.subr.bf16.mxu1 %v2886_v10 }
   0x7   :  { %13 = vsyncpa [#allocation8], 0  ;;  %2593 = vmatpush3.bf16.msra.mxu1 %v2946_v6  ;;  %181 = vmatprep.mubr.f32.mxu1 %v2885_v2  ;;  %v34_v11 = vld [vmem:[%s3418_s0 + $0x30] sm:$0xff]  ;;  %v2964_v12 = vpack.c.bf16 %v213_v8, %v212_v7  ;;  %v35_v13 = vld [vmem:[%s3418_s0 + $0x38] sm:$0xff]  ;;  %vm2887_vm2 = vmmov 0   ;;  %v39_v20 = vlaneseq  ;;  %s2889_s26 = smov 32  }
   0x8   :  { %2594 = vmatprep.subr.bf16.mxu1 %v2886_v10  ;;  %2245 = vmatmul.mubr.msk.f32.vlgmr.msra.gmra.mrb[0].mxu0 %vm51_vm1, %v28_v9  ;;  %v214_v14 = vld [vmem:[%s3422_s4] sm:$0xff]  ;;  %v215_v15 = vld [vmem:[%s3422_s4 + $0x8] sm:$0xff]  ;;  %v216_v17 = vld [vmem:[%s3422_s4 + $0x10] sm:$0xff]  ;;  %vm219_vm3 = vcmask 261120   ;;  %vm1958_vm4 = vcmask 523264   ;;  %vm2098_vm5 = vcmask 7168  }
   0x9   :  { %151 = vmatprep.mubr.f32.mxu0 %v2885_v2  ;;  %2615 = vmatprep.subr.bf16.mxu0 %v2886_v10  ;;  %v2989_v16 = vpack.c.bf16 %v215_v15, %v214_v14  ;;  %v217_v18 = vld [vmem:[%s3422_s4 + $0x18] sm:$0xff]  ;;  %v40_v21 = vshrl.u32 %v39_v20, 7  ;;  %v37_v27 = vld [vmem:[%s3420_s2] sm:$0x3]  ;;  %s2888_s2 = smov 64   ;;  %v29_v63 = vld [vmem:[%s3418_s0 + $0x8] sm:$0xff] }
   0xa   :  { %2251 = vmatmul.mubr.msk.f32.gmra.mrb[2].mxu1 %vm51_vm1, %v34_v11  ;;  %2617 = vmatpush3.bf16.msra.mxu0 %v2946_v6  ;;  %v3000_v19 = vpack.c.bf16 %v217_v18, %v216_v17 }
   0xb   :  { %187 = vmatprep.mubr.f32.mxu1 %v2885_v2  ;;  %2596 = vmatpush3.bf16.msra.mxu1 %v2964_v12  ;;  %v41_v25 = vsub.s32 0, %v40_v21  ;;  %v45_v35 = vsub.s32 1, %v40_v21 }
   0xc   :  { %2597 = vmatprep.subr.bf16.mxu1 %v2886_v10  ;;  %2618 = vmatprep.subr.bf16.mxu0 %v2886_v10 }
   0xd   :  { %v3027_v30 = vrot.slane %v37_v27, %v41_v25  ;;  %v3032_v38 = vrot.slane %v37_v27, %v45_v35  ;;  %2246 = vmatmul.mubr.msk.f32.gmra.mrb[2].mxu0 %vm51_vm1, %v29_v63 }
   0xe   :  { %2252 = vmatmul.mubr.msk.f32.gmra.mrb[4].mxu1 %vm51_vm1, %v35_v13  ;;  %2620 = vmatpush3.bf16.msra.mxu0 %v2964_v12 }
   0xf   :  { %2395 = vmatprep.mubr.msk.f32.mxu1 %vm2887_vm2, %v2885_v2  ;;  %2627 = vmatprep.subr.bf16.mxu0 %v2886_v10 }
  0x10   :  { %157 = vmatprep.mubr.f32.mxu0 %v2885_v2 }
  0x12   :  { %2396 = vmatmul.mubr.f32.vlgmr.msra.gmra.mrb[6].mxu1 %v2885_v2 }
  0x13   :  { %2599 = vmatpush3.bf16.msra.mxu1 %v2989_v16  ;;  %2406 = vmatprep.mubr.msk.f32.mxu1 %vm2887_vm2, %v2885_v2 }
  0x14   :  { %2600 = vmatprep.subr.bf16.mxu1 %v2886_v10 }
  0x17   :  { %2602 = vmatpush3.bf16.msra.mxu1 %v3000_v19 }
  0x18   :  { %2603 = vmatprep.subr.bf16.mxu1 %v2886_v10 }
  0x1a   :  { %2407 = vmatmul.mubr.f32.vlgmr.msra.gmra.mrb[8].mxu1 %v2885_v2 }
  0x1b   :  { %2605 = vmatpush3.bf16.msra.mxu1 %v2946_v6  ;;  %2417 = vmatprep.mubr.msk.f32.mxu1 %vm2887_vm2, %v2885_v2 }
  0x1c   :  { %2606 = vmatprep.subr.bf16.mxu1 %v2886_v10 }
  0x1f   :  { %2608 = vmatpush3.bf16.msra.mxu1 %v2964_v12 }
  0x20   :  { %2609 = vmatprep.subr.bf16.mxu1 %v2886_v10 }
  0xd9   :  { %v3014_v22 = vpop.f32.mrb[0].mxu1 }
  0xda   :  { %v3016_v23 = vpop.f32.mrb[1].mxu1 }
  0xdb   :  { %v147_v24 = vpop.f32.mrb[0].mxu0 }
  0xdc   :  { %v3018_v26 = vpop.f32.mrb[1].mxu0  ;;  %v148_v33 = vadd.f32 %v147_v24, %v3027_v30 }
  0xdd   :  { %v3023_v28 = vpop.f32.mrb[2].mxu1 }
  0xde   :  { %v3025_v29 = vpop.f32.mrb[3].mxu1 }
  0xdf   :  { %v186_v18 = vadd.f32 %v3025_v29, %v3032_v38 }
  0xe0   :  { %v153_v8 = vpop.f32.mrb[2].mxu0 }
  0xe1   :  { %v3029_v31 = vpop.f32.mrb[4].mxu1  ;;  %v154_v13 = vadd.f32 %v153_v8, %v3027_v30  ;;  %v3073_v21 = vpop.f32.mrb[3].mxu0 }
  0xe2   :  { %v191_v32 = vpop.f32.mrb[5].mxu1 }
  0xe3   :  { %v192_v39 = vadd.f32 %v191_v32, %v3032_v38 }
  0xe5   :  { %v289_v34 = vpop.f32.mrb[6].mxu1 }
  0xe6   :  { %v293_v36 = vadd.f32 %v289_v34, %v148_v33  ;;  %v2397_v37 = vpop.f32.mrb[7].mxu1 }
  0xe8   :  { %2715 = vtanh.f32 %v293_v36  ;;  %v2253_v45 = vmul.f32 -1.442695, %v293_v36 }
  0xed   :  { %v362_v40 = vpop.f32.mrb[8].mxu1 }
  0xee   :  { %v366_v41 = vadd.f32 %v362_v40, %v192_v39  ;;  %v2408_v42 = vpop.f32.mrb[9].mxu1 }
  0xf0   :  { %2717 = vtanh.f32 %v366_v41  ;;  %v2254_v46 = vmul.f32 -1.442695, %v366_v41 }
  0xf1   :  { %2719 = vpow2.f32 %v2253_v45 }
  0xf2   :  { %v2716_v43 = vpop.eup %2715  ;;  %2721 = vpow2.f32 %v2254_v46 }
  0xf3   :  { %376 = vrot.lane.b32.xlu0 %v2716_v43, %s2888_s2 }
  0xfa   :  { %v2718_v44 = vpop.eup %2717 }
  0xfb   :  { %400 = vrot.lane.b32.xlu0 %v2718_v44, %s2888_s2  ;;  %v2720_v47 = vpop.eup %2719 }
  0xfc   :  { %v370_v48 = vadd.f32 1.0, %v2720_v47  ;;  %v2722_v49 = vpop.eup %2721 }
  0xfd   :  { %v394_v50 = vadd.f32 1.0, %v2722_v49 }
  0xfe   :  { %2723 = vrcp.f32 %v370_v48 }
  0xff   :  { %2725 = vrcp.f32 %v394_v50 }
 0x108   :  { %v2724_v51 = vpop.eup %2723 }
 0x109   :  { %v2726_v54 = vpop.eup %2725  ;;  %v374_v57 = vmul.f32 0.0, %v2724_v51 }
 0x10a   :  { %v398_v60 = vmul.f32 0.0, %v2726_v54 }
 0x165   :  { %v377_v52 = vpop.permute.xlu0 %376 }
 0x166   :  { %v379_v53 = vmul.f32 %v2724_v51, %v377_v52  ;;  %v31_v52 = vld [vmem:[%s3418_s0 + $0x18] sm:$0xff] }
 0x168   :  { %381 = vrot.lane.b32.xlu1 %v379_v53, %s2889_s26 }
 0x16d   :  { %v401_v55 = vpop.permute.xlu0 %400 }
 0x16e   :  { %v403_v56 = vmul.f32 %v2726_v54, %v401_v55  ;;  %v32_v55 = vld [vmem:[%s3418_s0 + $0x20] sm:$0xff] }
 0x170   :  { %405 = vrot.lane.b32.xlu1 %v403_v56, %s2889_s26 }
 0x1da   :  { %v382_v58 = vpop.permute.xlu1 %381 }
 0x1db   :  { %v3039_v59 = vadd.f32 %v382_v58, %v374_v57 }
 0x1dd   :  { %2727 = vtanh.f32 %v3039_v59 }
 0x1e2   :  { %v406_v61 = vpop.permute.xlu1 %405 }
 0x1e3   :  { %v3042_v62 = vadd.f32 %v406_v61, %v398_v60 }
 0x1e5   :  { %2729 = vtanh.f32 %v3042_v62 }
 0x1e7   :  { %v2728_v0 = vpop.eup %2727 }
 0x1e8   :  { %387 = vrot.lane.b32.xlu0 %v2728_v0, %s2888_s2 }
 0x1ef   :  { %v2730_v1 = vpop.eup %2729 }
 0x1f0   :  { %411 = vrot.lane.b32.xlu1 %v2730_v1, %s2888_s2 }
 0x25a   :  { %v388_v3 = vpop.permute.xlu0 %387 }
 0x25b   :  { %v390_v4 = vmul.f32 %v2724_v51, %v388_v3  ;;  %v30_v51 = vld [vmem:[%s3418_s0 + $0x10] sm:$0xff] }
 0x25c   :  { %2247 = vmatmul.mubr.msk.f32.gmra.mrb[4].mxu0 %vm51_vm1, %v30_v51 }
 0x25d   :  { %416 = vrot.lane.b32.xlu0 %v390_v4, %s2889_s26  ;;  %163 = vmatprep.mubr.f32.mxu0 %v2885_v2 }
 0x260   :  { %2248 = vmatmul.mubr.msk.f32.gmra.mrb[6].mxu0 %vm51_vm1, %v31_v52 }
 0x261   :  { %169 = vmatprep.mubr.f32.mxu0 %v2885_v2 }
 0x262   :  { %v412_v5 = vpop.permute.xlu1 %411 }
 0x263   :  { %v414_v7 = vmul.f32 %v2726_v54, %v412_v5  ;;  %v180_v5 = vadd.f32 %v3016_v23, %v3032_v38 }
 0x264   :  { %2249 = vmatmul.mubr.msk.f32.gmra.mrb[8].mxu0 %vm51_vm1, %v32_v55 }
 0x265   :  { %421 = vrot.lane.b32.xlu1 %v414_v7, %s2889_s26  ;;  %2439 = vmatprep.mubr.msk.f32.mxu0 %vm2887_vm2, %v2885_v2 }
 0x2cf   :  { %v417_v9 = vpop.permute.xlu0 %416 }
 0x2d0   :  { %419 = vst.msk [vmem:[#allocation4] sm:$0xff] %vm219_vm3, %v417_v9  ;;  %2418 = vmatmul.mubr.msk.f32.vlgmr.msra.gmra.mrb[10].mxu1 %vm219_vm3, %v417_v9 }
 0x2d1   :  { %2611 = vmatpush3.bf16.msra.mxu1 %v2989_v16  ;;  %2428 = vmatprep.mubr.msk.f32.mxu1 %vm2887_vm2, %v2885_v2 }
 0x2d2   :  { %2612 = vmatprep.subr.bf16.mxu1 %v2886_v10 }
 0x2d5   :  { %2614 = vmatpush3.bf16.msra.mxu1 %v3000_v19 }
 0x2d6   :  { %2621 = vmatprep.subr.bf16.mxu1 %v2886_v10 }
 0x2d7   :  { %v422_v11 = vpop.permute.xlu1 %421 }
 0x2d8   :  { %425 = vst.msk [vmem:[#allocation5 + $0x38] sm:$0xff] %vm219_vm3, %v422_v11  ;;  %2429 = vmatmul.mubr.msk.f32.vlgmr.msra.gmra.mrb[12].mxu1 %vm219_vm3, %v422_v11 }
 0x2d9   :  { %2623 = vmatpush3.bf16.msra.mxu1 %v2989_v16  ;;  %2450 = vmatprep.mubr.msk.f32.mxu1 %vm2887_vm2, %v2885_v2 }
 0x2da   :  { %2624 = vmatprep.subr.bf16.mxu1 %v2886_v10 }
 0x2dd   :  { %2626 = vmatpush3.bf16.msra.mxu1 %v3000_v19 }
 0x2de   :  { %2633 = vmatprep.subr.bf16.mxu1 %v2886_v10 }
 0x32f   :  { %v159_v60 = vpop.f32.mrb[4].mxu0 }
 0x330   :  { %v3107_v61 = vpop.f32.mrb[5].mxu0  ;;  %v160_v8 = vadd.f32 %v159_v60, %v3027_v30 }
 0x3a3   :  { %v496_v14 = vpop.f32.mrb[10].mxu1 }
 0x3a4   :  { %v500_v15 = vadd.f32 %v496_v14, %v154_v13  ;;  %v2419_v17 = vpop.f32.mrb[11].mxu1 }
 0x3a6   :  { %v2257_v34 = vmul.f32 -1.442695, %v500_v15 }
 0x3ab   :  { %v571_v20 = vpop.f32.mrb[12].mxu1 }
 0x3ac   :  { %v575_v24 = vadd.f32 %v571_v20, %v186_v18  ;;  %v2430_v25 = vpop.f32.mrb[13].mxu1 }
 0x3ae   :  { %2731 = vtanh.f32 %v575_v24  ;;  %v2258_v33 = vmul.f32 -1.442695, %v575_v24 }
 0x3af   :  { %2733 = vtanh.f32 %v500_v15 }
 0x3b0   :  { %2735 = vpow2.f32 %v2258_v33 }
 0x3b1   :  { %2737 = vpow2.f32 %v2257_v34 }
 0x3b8   :  { %v2732_v27 = vpop.eup %2731 }
 0x3b9   :  { %609 = vrot.lane.b32.xlu0 %v2732_v27, %s2888_s2  ;;  %v2734_v32 = vpop.eup %2733 }
 0x3ba   :  { %v2736_v35 = vpop.eup %2735 }
 0x3bb   :  { %v603_v36 = vadd.f32 1.0, %v2736_v35  ;;  %v2738_v29 = vpop.eup %2737 }
 0x3bc   :  { %v579_v37 = vadd.f32 1.0, %v2738_v29 }
 0x3bd   :  { %585 = vrot.lane.b32.xlu0 %v2734_v32, %s2888_s2  ;;  %2739 = vrcp.f32 %v603_v36 }
 0x3be   :  { %2741 = vrcp.f32 %v579_v37 }
 0x3c7   :  { %v2740_v39 = vpop.eup %2739 }
 0x3c8   :  { %v2742_v42 = vpop.eup %2741  ;;  %v607_v45 = vmul.f32 %v2740_v39, %v3042_v62  ;;  %v3109_v62 = vpop.f32.mrb[6].mxu0 }
 0x3c9   :  { %v583_v48 = vmul.f32 %v2742_v42, %v3039_v59  ;;  %v3127_v1 = vpop.f32.mrb[7].mxu0 }
 0x3ca   :  { %v3129_v3 = vpop.f32.mrb[8].mxu0 }
 0x3cb   :  { %v3131_v4 = vpop.f32.mrb[9].mxu0 }
 0x42b   :  { %v610_v40 = vpop.permute.xlu0 %609 }
 0x42c   :  { %v612_v41 = vmul.f32 %v2740_v39, %v610_v40 }
 0x42e   :  { %614 = vrot.lane.b32.xlu1 %v612_v41, %s2889_s26 }
 0x42f   :  { %v586_v43 = vpop.permute.xlu0 %585 }
 0x430   :  { %v588_v44 = vmul.f32 %v2742_v42, %v586_v43 }
 0x432   :  { %590 = vrot.lane.b32.xlu1 %v588_v44, %s2889_s26 }
 0x4a0   :  { %v615_v46 = vpop.permute.xlu1 %614 }
 0x4a1   :  { %v3080_v47 = vadd.f32 %v615_v46, %v607_v45 }
 0x4a3   :  { %2743 = vtanh.f32 %v3080_v47 }
 0x4a4   :  { %v591_v49 = vpop.permute.xlu1 %590 }
 0x4a5   :  { %v3084_v50 = vadd.f32 %v591_v49, %v583_v48 }
 0x4a7   :  { %2745 = vtanh.f32 %v3084_v50 }
 0x4ad   :  { %v2744_v53 = vpop.eup %2743 }
 0x4ae   :  { %620 = vrot.lane.b32.xlu0 %v2744_v53, %s2888_s2  ;;  %v174_v53 = vadd.f32 %v3131_v4, %v3032_v38 }
 0x4b1   :  { %v2746_v54 = vpop.eup %2745 }
 0x4b2   :  { %596 = vrot.lane.b32.xlu0 %v2746_v54, %s2888_s2 }
 0x520   :  { %v621_v56 = vpop.permute.xlu0 %620 }
 0x521   :  { %v623_v57 = vmul.f32 %v2740_v39, %v621_v56 }
 0x523   :  { %631 = vrot.lane.b32.xlu1 %v623_v57, %s2889_s26  ;;  %v166_v57 = vadd.f32 %v3109_v62, %v3027_v30 }
 0x524   :  { %v597_v58 = vpop.permute.xlu0 %596 }
 0x525   :  { %v599_v59 = vmul.f32 %v2742_v42, %v597_v58 }
 0x527   :  { %625 = vrot.lane.b32.xlu1 %v599_v59, %s2889_s26 }
 0x595   :  { %v632_v63 = vpop.permute.xlu1 %631 }
 0x596   :  { %635 = vst.msk [vmem:[#allocation5 + $0x30] sm:$0xff] %vm219_vm3, %v632_v63  ;;  %2451 = vmatmul.mubr.msk.f32.vlgmr.msra.gmra.mrb[14].mxu1 %vm219_vm3, %v632_v63 }
 0x597   :  { %2635 = vmatpush3.bf16.msra.mxu1 %v2989_v16  ;;  %2472 = vmatprep.mubr.msk.f32.mxu1 %vm2887_vm2, %v2885_v2 }
 0x598   :  { %2636 = vmatprep.subr.bf16.mxu1 %v2886_v10 }
 0x599   :  { %v626_v0 = vpop.permute.xlu1 %625 }
 0x59a   :  { %629 = vst.msk [vmem:[#allocation4 + $0x8] sm:$0xff] %vm219_vm3, %v626_v0  ;;  %2440 = vmatmul.mubr.msk.f32.vlgmr.msra.gmra.mrb[10].mxu0 %vm219_vm3, %v626_v0 }
 0x59b   :  { %2629 = vmatpush3.bf16.msra.mxu0 %v2946_v6  ;;  %2638 = vmatpush3.bf16.msra.mxu1 %v3000_v19 }
 0x59c   :  { %2630 = vmatprep.subr.bf16.mxu0 %v2886_v10  ;;  %2461 = vmatprep.mubr.msk.f32.mxu0 %vm2887_vm2, %v2885_v2 }
 0x59d   :  { %2645 = vmatprep.subr.bf16.mxu1 %v2886_v10 }
 0x59f   :  { %2632 = vmatpush3.bf16.msra.mxu0 %v2964_v12 }
 0x5a0   :  { %2639 = vmatprep.subr.bf16.mxu0 %v2886_v10 }
 0x669   :  { %v781_v7 = vpop.f32.mrb[14].mxu1 }
 0x66a   :  { %v785_v9 = vadd.f32 %v781_v7, %v180_v5  ;;  %v2452_v11 = vpop.f32.mrb[15].mxu1 }
 0x66c   :  { %2747 = vtanh.f32 %v785_v9  ;;  %v2262_v20 = vmul.f32 -1.442695, %v785_v9 }
 0x66d   :  { %v706_v13 = vpop.f32.mrb[10].mxu0 }
 0x66e   :  { %v710_v14 = vadd.f32 %v706_v13, %v160_v8  ;;  %v2441_v15 = vpop.f32.mrb[11].mxu0 }
 0x670   :  { %2749 = vtanh.f32 %v710_v14  ;;  %v2261_v24 = vmul.f32 -1.442695, %v710_v14 }
 0x671   :  { %2751 = vpow2.f32 %v2262_v20 }
 0x672   :  { %2753 = vpow2.f32 %v2261_v24 }
 0x676   :  { %v2748_v17 = vpop.eup %2747 }
 0x677   :  { %819 = vrot.lane.b32.xlu0 %v2748_v17, %s2888_s2 }
 0x67a   :  { %v2750_v18 = vpop.eup %2749 }
 0x67b   :  { %795 = vrot.lane.b32.xlu0 %v2750_v18, %s2888_s2  ;;  %v2752_v23 = vpop.eup %2751 }
 0x67c   :  { %v813_v25 = vadd.f32 1.0, %v2752_v23  ;;  %v2754_v27 = vpop.eup %2753 }
 0x67d   :  { %v789_v32 = vadd.f32 1.0, %v2754_v27 }
 0x67e   :  { %2755 = vrcp.f32 %v813_v25 }
 0x67f   :  { %2757 = vrcp.f32 %v789_v32 }
 0x688   :  { %v2756_v33 = vpop.eup %2755 }
 0x689   :  { %v2758_v36 = vpop.eup %2757  ;;  %v817_v39 = vmul.f32 %v2756_v33, %v3080_v47 }
 0x68a   :  { %v793_v42 = vmul.f32 %v2758_v36, %v3084_v50 }
 0x6e9   :  { %v820_v34 = vpop.permute.xlu0 %819 }
 0x6ea   :  { %v822_v35 = vmul.f32 %v2756_v33, %v820_v34 }
 0x6ec   :  { %824 = vrot.lane.b32.xlu1 %v822_v35, %s2889_s26 }
 0x6ed   :  { %v796_v29 = vpop.permute.xlu0 %795 }
 0x6ee   :  { %v798_v37 = vmul.f32 %v2758_v36, %v796_v29 }
 0x6f0   :  { %800 = vrot.lane.b32.xlu1 %v798_v37, %s2889_s26 }
 0x75e   :  { %v825_v40 = vpop.permute.xlu1 %824 }
 0x75f   :  { %v3141_v41 = vadd.f32 %v825_v40, %v817_v39 }
 0x761   :  { %2759 = vtanh.f32 %v3141_v41 }
 0x762   :  { %v801_v43 = vpop.permute.xlu1 %800 }
 0x763   :  { %v3145_v44 = vadd.f32 %v801_v43, %v793_v42 }
 0x765   :  { %2761 = vtanh.f32 %v3145_v44 }
 0x76b   :  { %v2760_v45 = vpop.eup %2759 }
 0x76c   :  { %830 = vrot.lane.b32.xlu0 %v2760_v45, %s2888_s2  ;;  %v172_v45 = vadd.f32 %v3129_v3, %v3027_v30 }
 0x76f   :  { %v2762_v46 = vpop.eup %2761 }
 0x770   :  { %806 = vrot.lane.b32.xlu0 %v2762_v46, %s2888_s2 }
 0x7de   :  { %v831_v48 = vpop.permute.xlu0 %830 }
 0x7df   :  { %v833_v47 = vmul.f32 %v2756_v33, %v831_v48 }
 0x7e1   :  { %841 = vrot.lane.b32.xlu1 %v833_v47, %s2889_s26 }
 0x7e2   :  { %v807_v49 = vpop.permute.xlu0 %806 }
 0x7e3   :  { %v809_v51 = vmul.f32 %v2758_v36, %v807_v49 }
 0x7e5   :  { %835 = vrot.lane.b32.xlu1 %v809_v51, %s2889_s26 }
 0x853   :  { %v842_v50 = vpop.permute.xlu1 %841 }
 0x854   :  { %845 = vst.msk [vmem:[#allocation5 + $0x28] sm:$0xff] %vm219_vm3, %v842_v50  ;;  %2473 = vmatmul.mubr.msk.f32.vlgmr.msra.gmra.mrb[16].mxu1 %vm219_vm3, %v842_v50 }
 0x855   :  { %2647 = vmatpush3.bf16.msra.mxu1 %v2989_v16  ;;  %2494 = vmatprep.mubr.msk.f32.mxu1 %vm2887_vm2, %v2885_v2 }
 0x856   :  { %2648 = vmatprep.subr.bf16.mxu1 %v2886_v10 }
 0x857   :  { %v836_v52 = vpop.permute.xlu1 %835 }
 0x858   :  { %839 = vst.msk [vmem:[#allocation4 + $0x10] sm:$0xff] %vm219_vm3, %v836_v52  ;;  %2462 = vmatmul.mubr.msk.f32.vlgmr.msra.gmra.mrb[12].mxu0 %vm219_vm3, %v836_v52 }
 0x859   :  { %2641 = vmatpush3.bf16.msra.mxu0 %v2946_v6  ;;  %2650 = vmatpush3.bf16.msra.mxu1 %v3000_v19 }
 0x85a   :  { %2642 = vmatprep.subr.bf16.mxu0 %v2886_v10  ;;  %2483 = vmatprep.mubr.msk.f32.mxu0 %vm2887_vm2, %v2885_v2 }
 0x85b   :  { %2657 = vmatprep.subr.bf16.mxu1 %v2886_v10 }
 0x85d   :  { %2644 = vmatpush3.bf16.msra.mxu0 %v2964_v12 }
 0x85e   :  { %2651 = vmatprep.subr.bf16.mxu0 %v2886_v10 }
 0x927   :  { %v991_v54 = vpop.f32.mrb[16].mxu1 }
 0x928   :  { %v995_v55 = vadd.f32 %v991_v54, %v174_v53  ;;  %v2474_v56 = vpop.f32.mrb[17].mxu1 }
 0x92a   :  { %2763 = vtanh.f32 %v995_v55  ;;  %v2266_v5 = vmul.f32 -1.442695, %v995_v55 }
 0x92b   :  { %v916_v58 = vpop.f32.mrb[12].mxu0 }
 0x92c   :  { %v920_v59 = vadd.f32 %v916_v58, %v166_v57  ;;  %v2463_v60 = vpop.f32.mrb[13].mxu0 }
 0x92e   :  { %2765 = vtanh.f32 %v920_v59  ;;  %v2265_v4 = vmul.f32 -1.442695, %v920_v59 }
 0x92f   :  { %2767 = vpow2.f32 %v2266_v5 }
 0x930   :  { %2769 = vpow2.f32 %v2265_v4 }
 0x934   :  { %v2764_v63 = vpop.eup %2763 }
 0x935   :  { %1029 = vrot.lane.b32.xlu0 %v2764_v63, %s2888_s2 }
 0x938   :  { %v2766_v0 = vpop.eup %2765 }
 0x939   :  { %1005 = vrot.lane.b32.xlu0 %v2766_v0, %s2888_s2  ;;  %v2768_v7 = vpop.eup %2767 }
 0x93a   :  { %v1023_v8 = vadd.f32 1.0, %v2768_v7  ;;  %v2770_v9 = vpop.eup %2769 }
 0x93b   :  { %v999_v62 = vadd.f32 1.0, %v2770_v9 }
 0x93c   :  { %2771 = vrcp.f32 %v1023_v8 }
 0x93d   :  { %2773 = vrcp.f32 %v999_v62 }
 0x946   :  { %v2772_v11 = vpop.eup %2771 }
 0x947   :  { %v2774_v15 = vpop.eup %2773  ;;  %v1027_v20 = vmul.f32 %v2772_v11, %v3141_v41  ;;  %v168_v41 = vadd.f32 %v3127_v1, %v3032_v38 }
 0x948   :  { %v1003_v25 = vmul.f32 %v2774_v15, %v3145_v44 }
 0x9a7   :  { %v1030_v13 = vpop.permute.xlu0 %1029 }
 0x9a8   :  { %v1032_v14 = vmul.f32 %v2772_v11, %v1030_v13 }
 0x9aa   :  { %1034 = vrot.lane.b32.xlu1 %v1032_v14, %s2889_s26 }
 0x9ab   :  { %v1006_v17 = vpop.permute.xlu0 %1005 }
 0x9ac   :  { %v1008_v18 = vmul.f32 %v2774_v15, %v1006_v17 }
 0x9ae   :  { %1010 = vrot.lane.b32.xlu1 %v1008_v18, %s2889_s26 }
 0xa1c   :  { %v1035_v24 = vpop.permute.xlu1 %1034 }
 0xa1d   :  { %v3177_v23 = vadd.f32 %v1035_v24, %v1027_v20  ;;  %v162_v20 = vadd.f32 %v3107_v61, %v3032_v38 }
 0xa1f   :  { %2775 = vtanh.f32 %v3177_v23 }
 0xa20   :  { %v1011_v27 = vpop.permute.xlu1 %1010 }
 0xa21   :  { %v3181_v32 = vadd.f32 %v1011_v27, %v1003_v25  ;;  %v178_v27 = vadd.f32 %v3014_v22, %v3027_v30 }
 0xa23   :  { %2777 = vtanh.f32 %v3181_v32 }
 0xa29   :  { %v2776_v33 = vpop.eup %2775 }
 0xa2a   :  { %1040 = vrot.lane.b32.xlu0 %v2776_v33, %s2888_s2 }
 0xa2d   :  { %v2778_v34 = vpop.eup %2777 }
 0xa2e   :  { %1016 = vrot.lane.b32.xlu0 %v2778_v34, %s2888_s2 }
 0xa9c   :  { %v1041_v35 = vpop.permute.xlu0 %1040 }
 0xa9d   :  { %v1043_v36 = vmul.f32 %v2772_v11, %v1041_v35 }
 0xa9f   :  { %1051 = vrot.lane.b32.xlu1 %v1043_v36, %s2889_s26 }
 0xaa0   :  { %v1017_v29 = vpop.permute.xlu0 %1016 }
 0xaa1   :  { %v1019_v37 = vmul.f32 %v2774_v15, %v1017_v29 }
 0xaa3   :  { %1045 = vrot.lane.b32.xlu1 %v1019_v37, %s2889_s26 }
 0xb11   :  { %v1052_v39 = vpop.permute.xlu1 %1051 }
 0xb12   :  { %1055 = vst.msk [vmem:[#allocation5 + $0x20] sm:$0xff] %vm219_vm3, %v1052_v39  ;;  %2495 = vmatmul.mubr.msk.f32.vlgmr.msra.gmra.mrb[18].mxu1 %vm219_vm3, %v1052_v39 }
 0xb13   :  { %2659 = vmatpush3.bf16.msra.mxu1 %v2989_v16  ;;  %2516 = vmatprep.mubr.msk.f32.mxu1 %vm2887_vm2, %v2885_v2 }
 0xb14   :  { %2660 = vmatprep.subr.bf16.mxu1 %v2886_v10 }
 0xb15   :  { %v1046_v40 = vpop.permute.xlu1 %1045 }
 0xb16   :  { %1049 = vst.msk [vmem:[#allocation4 + $0x18] sm:$0xff] %vm219_vm3, %v1046_v40  ;;  %2484 = vmatmul.mubr.msk.f32.vlgmr.msra.gmra.mrb[14].mxu0 %vm219_vm3, %v1046_v40 }
 0xb17   :  { %2653 = vmatpush3.bf16.msra.mxu0 %v2946_v6  ;;  %2662 = vmatpush3.bf16.msra.mxu1 %v3000_v19 }
 0xb18   :  { %2654 = vmatprep.subr.bf16.mxu0 %v2886_v10  ;;  %2505 = vmatprep.mubr.msk.f32.mxu0 %vm2887_vm2, %v2885_v2 }
 0xb19   :  { %2669 = vmatprep.subr.bf16.mxu1 %v2886_v10 }
 0xb1b   :  { %2656 = vmatpush3.bf16.msra.mxu0 %v2964_v12 }
 0xb1c   :  { %2663 = vmatprep.subr.bf16.mxu0 %v2886_v10 }
 0xbe5   :  { %v1201_v42 = vpop.f32.mrb[18].mxu1 }
 0xbe6   :  { %v1205_v43 = vadd.f32 %v1201_v42, %v168_v41  ;;  %v2496_v44 = vpop.f32.mrb[19].mxu1 }
 0xbe8   :  { %2779 = vtanh.f32 %v1205_v43  ;;  %v2270_v50 = vmul.f32 -1.442695, %v1205_v43 }
 0xbe9   :  { %v1126_v46 = vpop.f32.mrb[14].mxu0 }
 0xbea   :  { %v1130_v48 = vadd.f32 %v1126_v46, %v172_v45  ;;  %v2485_v47 = vpop.f32.mrb[15].mxu0 }
 0xbec   :  { %2781 = vtanh.f32 %v1130_v48  ;;  %v2269_v1 = vmul.f32 -1.442695, %v1130_v48 }
 0xbed   :  { %2783 = vpow2.f32 %v2270_v50 }
 0xbee   :  { %2785 = vpow2.f32 %v2269_v1 }
 0xbf2   :  { %v2780_v49 = vpop.eup %2779 }
 0xbf3   :  { %1239 = vrot.lane.b32.xlu0 %v2780_v49, %s2888_s2 }
 0xbf6   :  { %v2782_v51 = vpop.eup %2781 }
 0xbf7   :  { %1215 = vrot.lane.b32.xlu0 %v2782_v51, %s2888_s2  ;;  %v2784_v52 = vpop.eup %2783 }
 0xbf8   :  { %v1233_v53 = vadd.f32 1.0, %v2784_v52  ;;  %v2786_v54 = vpop.eup %2785 }
 0xbf9   :  { %v1209_v3 = vadd.f32 1.0, %v2786_v54 }
 0xbfa   :  { %2787 = vrcp.f32 %v1233_v53 }
 0xbfb   :  { %2789 = vrcp.f32 %v1209_v3 }
 0xc04   :  { %v2788_v55 = vpop.eup %2787 }
 0xc05   :  { %v2790_v58 = vpop.eup %2789  ;;  %v1237_v63 = vmul.f32 %v2788_v55, %v3177_v23 }
 0xc06   :  { %v1213_v4 = vmul.f32 %v2790_v58, %v3181_v32 }
 0xc65   :  { %v1240_v56 = vpop.permute.xlu0 %1239 }
 0xc66   :  { %v1242_v57 = vmul.f32 %v2788_v55, %v1240_v56 }
 0xc68   :  { %1244 = vrot.lane.b32.xlu1 %v1242_v57, %s2889_s26 }
 0xc69   :  { %v1216_v59 = vpop.permute.xlu0 %1215 }
 0xc6a   :  { %v1218_v60 = vmul.f32 %v2790_v58, %v1216_v59 }
 0xc6c   :  { %1220 = vrot.lane.b32.xlu1 %v1218_v60, %s2889_s26 }
 0xcda   :  { %v1245_v0 = vpop.permute.xlu1 %1244 }
 0xcdb   :  { %v3213_v5 = vadd.f32 %v1245_v0, %v1237_v63  ;;  %v184_v0 = vadd.f32 %v3023_v28, %v3027_v30 }
 0xcdd   :  { %2791 = vtanh.f32 %v3213_v5 }
 0xcde   :  { %v1221_v7 = vpop.permute.xlu1 %1220 }
 0xcdf   :  { %v3217_v8 = vadd.f32 %v1221_v7, %v1213_v4 }
 0xce1   :  { %2793 = vtanh.f32 %v3217_v8 }
 0xce7   :  { %v2792_v9 = vpop.eup %2791 }
 0xce8   :  { %1250 = vrot.lane.b32.xlu0 %v2792_v9, %s2888_s2 }
 0xceb   :  { %v2794_v62 = vpop.eup %2793 }
 0xcec   :  { %1226 = vrot.lane.b32.xlu0 %v2794_v62, %s2888_s2 }
 0xd5a   :  { %v1251_v11 = vpop.permute.xlu0 %1250 }
 0xd5b   :  { %v1253_v13 = vmul.f32 %v2788_v55, %v1251_v11 }
 0xd5d   :  { %1261 = vrot.lane.b32.xlu1 %v1253_v13, %s2889_s26 }
 0xd5e   :  { %v1227_v14 = vpop.permute.xlu0 %1226 }
 0xd5f   :  { %v1229_v15 = vmul.f32 %v2790_v58, %v1227_v14 }
 0xd61   :  { %1255 = vrot.lane.b32.xlu1 %v1229_v15, %s2889_s26 }
 0xdcf   :  { %v1262_v17 = vpop.permute.xlu1 %1261 }
 0xdd0   :  { %1265 = vst.msk [vmem:[#allocation5 + $0x18] sm:$0xff] %vm219_vm3, %v1262_v17  ;;  %2517 = vmatmul.mubr.msk.f32.vlgmr.msra.gmra.mrb[20].mxu1 %vm219_vm3, %v1262_v17 }
 0xdd1   :  { %2671 = vmatpush3.bf16.msra.mxu1 %v2989_v16  ;;  %2538 = vmatprep.mubr.msk.f32.mxu1 %vm2887_vm2, %v2885_v2 }
 0xdd2   :  { %2672 = vmatprep.subr.bf16.mxu1 %v2886_v10 }
 0xdd3   :  { %v1256_v18 = vpop.permute.xlu1 %1255 }
 0xdd4   :  { %1259 = vst.msk [vmem:[#allocation4 + $0x20] sm:$0xff] %vm219_vm3, %v1256_v18  ;;  %2506 = vmatmul.mubr.msk.f32.vlgmr.msra.gmra.mrb[16].mxu0 %vm219_vm3, %v1256_v18 }
 0xdd5   :  { %2665 = vmatpush3.bf16.msra.mxu0 %v2946_v6  ;;  %2674 = vmatpush3.bf16.msra.mxu1 %v3000_v19 }
 0xdd6   :  { %2666 = vmatprep.subr.bf16.mxu0 %v2886_v10  ;;  %2527 = vmatprep.mubr.msk.f32.mxu0 %vm2887_vm2, %v2885_v2 }
 0xdd7   :  { %2681 = vmatprep.subr.bf16.mxu1 %v2886_v10 }
 0xdd9   :  { %2668 = vmatpush3.bf16.msra.mxu0 %v2964_v12 }
 0xdda   :  { %2675 = vmatprep.subr.bf16.mxu0 %v2886_v10 }
 0xea3   :  { %v1411_v24 = vpop.f32.mrb[20].mxu1 }
 0xea4   :  { %v1415_v23 = vadd.f32 %v1411_v24, %v162_v20  ;;  %v2518_v25 = vpop.f32.mrb[21].mxu1 }
 0xea6   :  { %2795 = vtanh.f32 %v1415_v23  ;;  %v2274_v29 = vmul.f32 -1.442695, %v1415_v23 }
 0xea7   :  { %v1336_v32 = vpop.f32.mrb[16].mxu0 }
 0xea8   :  { %v1340_v33 = vadd.f32 %v1336_v32, %v178_v27  ;;  %v2507_v34 = vpop.f32.mrb[17].mxu0 }
 0xeaa   :  { %2797 = vtanh.f32 %v1340_v33  ;;  %v2273_v61 = vmul.f32 -1.442695, %v1340_v33 }
 0xeab   :  { %2799 = vpow2.f32 %v2274_v29 }
 0xeac   :  { %2801 = vpow2.f32 %v2273_v61 }
 0xeb0   :  { %v2796_v35 = vpop.eup %2795 }
 0xeb1   :  { %1449 = vrot.lane.b32.xlu0 %v2796_v35, %s2888_s2 }
 0xeb4   :  { %v2798_v36 = vpop.eup %2797 }
 0xeb5   :  { %1425 = vrot.lane.b32.xlu0 %v2798_v36, %s2888_s2  ;;  %v2800_v37 = vpop.eup %2799 }
 0xeb6   :  { %v1443_v39 = vadd.f32 1.0, %v2800_v37  ;;  %v2802_v40 = vpop.eup %2801  ;;  %v150_v37 = vadd.f32 %v3018_v26, %v3032_v38 }
 0xeb7   :  { %v1419_v22 = vadd.f32 1.0, %v2802_v40 }
 0xeb8   :  { %2803 = vrcp.f32 %v1443_v39 }
 0xeb9   :  { %2805 = vrcp.f32 %v1419_v22 }
 0xec2   :  { %v2804_v41 = vpop.eup %2803 }
 0xec3   :  { %v2806_v44 = vpop.eup %2805  ;;  %v1447_v48 = vmul.f32 %v2804_v41, %v3213_v5 }
 0xec4   :  { %v1423_v51 = vmul.f32 %v2806_v44, %v3217_v8 }
 0xf23   :  { %v1450_v42 = vpop.permute.xlu0 %1449 }
 0xf24   :  { %v1452_v43 = vmul.f32 %v2804_v41, %v1450_v42 }
 0xf26   :  { %1454 = vrot.lane.b32.xlu1 %v1452_v43, %s2889_s26 }
 0xf27   :  { %v1426_v45 = vpop.permute.xlu0 %1425 }
 0xf28   :  { %v1428_v46 = vmul.f32 %v2806_v44, %v1426_v45 }
 0xf2a   :  { %1430 = vrot.lane.b32.xlu1 %v1428_v46, %s2889_s26 }
 0xf98   :  { %v1455_v47 = vpop.permute.xlu1 %1454 }
 0xf99   :  { %v1457_v49 = vadd.f32 %v1455_v47, %v1447_v48 }
 0xf9b   :  { %2807 = vtanh.f32 %v1457_v49 }
 0xf9c   :  { %v1431_v50 = vpop.permute.xlu1 %1430 }
 0xf9d   :  { %v1433_v1 = vadd.f32 %v1431_v50, %v1423_v51 }
 0xf9f   :  { %2809 = vtanh.f32 %v1433_v1 }
 0xfa5   :  { %v2808_v52 = vpop.eup %2807 }
 0xfa6   :  { %1460 = vrot.lane.b32.xlu0 %v2808_v52, %s2888_s2 }
 0xfa9   :  { %v2810_v53 = vpop.eup %2809 }
 0xfaa   :  { %1436 = vrot.lane.b32.xlu0 %v2810_v53, %s2888_s2 }
0x1018   :  { %v1461_v54 = vpop.permute.xlu0 %1460 }
0x1019   :  { %v1463_v3 = vmul.f32 %v2804_v41, %v1461_v54  ;;  %v190_v41 = vadd.f32 %v3029_v31, %v3027_v30 }
0x101b   :  { %1471 = vrot.lane.b32.xlu1 %v1463_v3, %s2889_s26 }
0x101c   :  { %v1437_v55 = vpop.permute.xlu0 %1436 }
0x101d   :  { %v1439_v56 = vmul.f32 %v2806_v44, %v1437_v55 }
0x101f   :  { %1465 = vrot.lane.b32.xlu1 %v1439_v56, %s2889_s26 }
0x108d   :  { %v1472_v57 = vpop.permute.xlu1 %1471 }
0x108e   :  { %1475 = vst.msk [vmem:[#allocation5 + $0x10] sm:$0xff] %vm219_vm3, %v1472_v57  ;;  %2539 = vmatmul.mubr.msk.f32.vlgmr.msra.gmra.mrb[22].mxu1 %vm219_vm3, %v1472_v57 }
0x108f   :  { %2683 = vmatpush3.bf16.msra.mxu1 %v2989_v16  ;;  %2560 = vmatprep.mubr.msk.f32.mxu1 %vm2887_vm2, %v2885_v2  ;;  %v156_v16 = vadd.f32 %v3073_v21, %v3032_v38 }
0x1090   :  { %2684 = vmatprep.subr.bf16.mxu1 %v2886_v10 }
0x1091   :  { %v1466_v58 = vpop.permute.xlu1 %1465 }
0x1092   :  { %1469 = vst.msk [vmem:[#allocation4 + $0x28] sm:$0xff] %vm219_vm3, %v1466_v58  ;;  %2528 = vmatmul.mubr.msk.f32.vlgmr.msra.gmra.mrb[18].mxu0 %vm219_vm3, %v1466_v58 }
0x1093   :  { %2677 = vmatpush3.bf16.msra.mxu0 %v2946_v6  ;;  %2686 = vmatpush3.bf16.msra.mxu1 %v3000_v19 }
0x1094   :  { %2678 = vmatprep.subr.bf16.mxu0 %v2886_v10  ;;  %2549 = vmatprep.mubr.msk.f32.mxu0 %vm2887_vm2, %v2885_v2 }
0x1097   :  { %2680 = vmatpush3.bf16.msra.mxu0 %v2964_v12 }
0x1161   :  { %v1621_v59 = vpop.f32.mrb[22].mxu1 }
0x1162   :  { %v1625_v60 = vadd.f32 %v1621_v59, %v156_v16  ;;  %v2540_v63 = vpop.f32.mrb[23].mxu1 }
0x1164   :  { %2811 = vtanh.f32 %v1625_v60  ;;  %v2278_v12 = vmul.f32 -1.442695, %v1625_v60 }
0x1165   :  { %v1546_v6 = vpop.f32.mrb[18].mxu0 }
0x1166   :  { %v1550_v5 = vadd.f32 %v1546_v6, %v184_v0  ;;  %v2529_v19 = vpop.f32.mrb[19].mxu0 }
0x1167   :  { %v1906_v19 = vld [vmem:[#allocation5 + $0x20] sm:$0xff] }
0x1168   :  { %2813 = vtanh.f32 %v1550_v5  ;;  %v2277_v21 = vmul.f32 -1.442695, %v1550_v5 }
0x1169   :  { %2815 = vpow2.f32 %v2278_v12  ;;  %v1951_v12 = vld [vmem:[%s3423_s5 + $0x8] sm:$0xff] }
0x116a   :  { %2817 = vpow2.f32 %v2277_v21  ;;  %v1952_v21 = vld [vmem:[%s3423_s5 + $0x10] sm:$0xff] }
0x116e   :  { %v2812_v10 = vpop.eup %2811 }
0x116f   :  { %1659 = vrot.lane.b32.xlu0 %v2812_v10, %s2888_s2  ;;  %v1908_v10 = vld [vmem:[#allocation5 + $0x30] sm:$0xff] }
0x1172   :  { %v2814_v2 = vpop.eup %2813 }
0x1173   :  { %1635 = vrot.lane.b32.xlu0 %v2814_v2, %s2888_s2  ;;  %v2816_v4 = vpop.eup %2815  ;;  %v1950_v2 = vld [vmem:[%s3423_s5] sm:$0xff] }
0x1174   :  { %v1653_v7 = vadd.f32 1.0, %v2816_v4  ;;  %v2818_v8 = vpop.eup %2817  ;;  %v2687_v4 = vpack.c.bf16 %v1951_v12, %v1950_v2 }
0x1175   :  { %v1629_v28 = vadd.f32 1.0, %v2818_v8 }
0x1176   :  { %2819 = vrcp.f32 %v1653_v7  ;;  %v1953_v7 = vld [vmem:[%s3423_s5 + $0x18] sm:$0xff]  ;;  %2688 = vmatprep.subr.bf16.mxu0 %v2687_v4 }
0x1177   :  { %2821 = vrcp.f32 %v1629_v28  ;;  %v2691_v8 = vpack.c.bf16 %v1953_v7, %v1952_v21  ;;  %v1954_v28 = vld [vmem:[%s3423_s5 + $0x20] sm:$0xff] }
0x1180   :  { %v2820_v9 = vpop.eup %2819 }
0x1181   :  { %v2822_v13 = vpop.eup %2821  ;;  %v1657_v17 = vmul.f32 %v2820_v9, %v1457_v49 }
0x1182   :  { %v1633_v24 = vmul.f32 %v2822_v13, %v1433_v1 }
0x11e1   :  { %v1660_v62 = vpop.permute.xlu0 %1659 }
0x11e2   :  { %v1662_v11 = vmul.f32 %v2820_v9, %v1660_v62 }
0x11e4   :  { %1664 = vrot.lane.b32.xlu1 %v1662_v11, %s2889_s26  ;;  %v1956_v11 = vld [vmem:[%s3423_s5 + $0x30] sm:$0xff] }
0x11e5   :  { %v1636_v14 = vpop.permute.xlu0 %1635 }
0x11e6   :  { %v1638_v15 = vmul.f32 %v2822_v13, %v1636_v14 }
0x11e8   :  { %1640 = vrot.lane.b32.xlu1 %v1638_v15, %s2889_s26 }
0x1256   :  { %v1665_v18 = vpop.permute.xlu1 %1664 }
0x1257   :  { %v1667_v20 = vadd.f32 %v1665_v18, %v1657_v17 }
0x1259   :  { %2823 = vtanh.f32 %v1667_v20 }
0x125a   :  { %v1641_v23 = vpop.permute.xlu1 %1640 }
0x125b   :  { %v1643_v25 = vadd.f32 %v1641_v23, %v1633_v24  ;;  %v1904_v24 = vld [vmem:[#allocation5 + $0x10] sm:$0xff]  ;;  %v1905_v23 = vld [vmem:[#allocation5 + $0x18] sm:$0xff] }
0x125d   :  { %2825 = vtanh.f32 %v1643_v25 }
0x1263   :  { %v2824_v27 = vpop.eup %2823 }
0x1264   :  { %1670 = vrot.lane.b32.xlu0 %v2824_v27, %s2888_s2  ;;  %v1909_v27 = vld [vmem:[#allocation5 + $0x38] sm:$0xff] }
0x1267   :  { %v2826_v32 = vpop.eup %2825 }
0x1268   :  { %1646 = vrot.lane.b32.xlu0 %v2826_v32, %s2888_s2 }
0x12d6   :  { %v1671_v33 = vpop.permute.xlu0 %1670 }
0x12d7   :  { %v1673_v34 = vmul.f32 %v2820_v9, %v1671_v33  ;;  %v1955_v9 = vld [vmem:[%s3423_s5 + $0x28] sm:$0xff]  ;;  %v1894_v33 = vld [vmem:[#allocation4] sm:$0xff] }
0x12d8   :  { %v2695_v62 = vpack.c.bf16 %v1955_v9, %v1954_v28 }
0x12d9   :  { %1681 = vrot.lane.b32.xlu1 %v1673_v34, %s2889_s26  ;;  %v1895_v34 = vld [vmem:[#allocation4 + $0x8] sm:$0xff] }
0x12da   :  { %v1647_v35 = vpop.permute.xlu0 %1646 }
0x12db   :  { %v1649_v36 = vmul.f32 %v2822_v13, %v1647_v35  ;;  %v1957_v13 = vld [vmem:[%s3423_s5 + $0x38] sm:$0xff] }
0x12dc   :  { %v2699_v14 = vpack.c.bf16 %v1957_v13, %v1956_v11 }
0x12dd   :  { %1675 = vrot.lane.b32.xlu1 %v1649_v36, %s2889_s26 }
0x134b   :  { %v1682_v29 = vpop.permute.xlu1 %1681 }
0x134c   :  { %1685 = vst.msk [vmem:[#allocation5 + $0x8] sm:$0xff] %vm219_vm3, %v1682_v29  ;;  %2561 = vmatmul.mubr.msk.f32.vlgmr.msra.gmra.mrb[24].mxu1 %vm219_vm3, %v1682_v29  ;;  %v1896_v29 = vld [vmem:[#allocation4 + $0x10] sm:$0xff] }
0x134f   :  { %v1676_v61 = vpop.permute.xlu1 %1675 }
0x1350   :  { %1679 = vst.msk [vmem:[#allocation4 + $0x30] sm:$0xff] %vm219_vm3, %v1676_v61  ;;  %2550 = vmatmul.mubr.msk.f32.vlgmr.msra.gmra.mrb[20].mxu0 %vm219_vm3, %v1676_v61 }
0x1351   :  { %2690 = vmatpush3.bf16.msra.mxu0 %v2687_v4 }
0x1352   :  { %2692 = vmatprep.subr.bf16.mxu0 %v2691_v8 }
0x1353   :  { %v1903_v60 = vld [vmem:[#allocation5 + $0x8] sm:$0xff] }
0x1355   :  { %2694 = vmatpush3.bf16.msra.mxu0 %v2691_v8 }
0x1356   :  { %2696 = vmatprep.subr.bf16.mxu0 %v2695_v62 }
0x1359   :  { %2698 = vmatpush3.bf16.msra.mxu0 %v2695_v62 }
0x135a   :  { %2700 = vmatprep.subr.bf16.mxu0 %v2699_v14 }
0x135d   :  { %2702 = vmatpush3.bf16.msra.mxu0 %v2699_v14 }
0x141f   :  { %v1830_v39 = vpop.f32.mrb[24].mxu1 }
0x1420   :  { %v1834_v40 = vadd.f32 %v1830_v39, %v150_v37  ;;  %v2562_v22 = vpop.f32.mrb[25].mxu1 }
0x1422   :  { %2827 = vtanh.f32 %v1834_v40  ;;  %v2282_v48 = vmul.f32 -1.442695, %v1834_v40  ;;  %v1897_v40 = vld [vmem:[#allocation4 + $0x18] sm:$0xff] }
0x1423   :  { %v1756_v42 = vpop.f32.mrb[20].mxu0 }
0x1424   :  { %v1760_v43 = vadd.f32 %v1756_v42, %v190_v41  ;;  %v2551_v44 = vpop.f32.mrb[21].mxu0  ;;  %v1898_v41 = vld [vmem:[#allocation4 + $0x20] sm:$0xff] }
0x1426   :  { %2829 = vtanh.f32 %v1760_v43  ;;  %v2281_v26 = vmul.f32 -1.442695, %v1760_v43 }
0x1427   :  { %2831 = vpow2.f32 %v2282_v48  ;;  %v1900_v48 = vld [vmem:[#allocation4 + $0x30] sm:$0xff] }
0x1428   :  { %2833 = vpow2.f32 %v2281_v26 }
0x142c   :  { %v2828_v45 = vpop.eup %2827 }
0x142d   :  { %1868 = vrot.lane.b32.xlu0 %v2828_v45, %s2888_s2  ;;  %v1899_v45 = vld [vmem:[#allocation4 + $0x28] sm:$0xff] }
0x1430   :  { %v2830_v46 = vpop.eup %2829 }
0x1431   :  { %1844 = vrot.lane.b32.xlu0 %v2830_v46, %s2888_s2  ;;  %v2832_v38 = vpop.eup %2831 }
0x1432   :  { %v1862_v47 = vadd.f32 1.0, %v2832_v38  ;;  %v2834_v49 = vpop.eup %2833 }
0x1433   :  { %v1838_v30 = vadd.f32 1.0, %v2834_v49 }
0x1434   :  { %2835 = vrcp.f32 %v1862_v47 }
0x1435   :  { %2837 = vrcp.f32 %v1838_v30 }
0x143e   :  { %v2836_v31 = vpop.eup %2835 }
0x143f   :  { %v2838_v1 = vpop.eup %2837  ;;  %v1866_v54 = vmul.f32 %v2836_v31, %v1667_v20 }
0x1440   :  { %v1842_v56 = vmul.f32 %v2838_v1, %v1643_v25  ;;  %v1907_v25 = vld [vmem:[#allocation5 + $0x28] sm:$0xff] }
0x149f   :  { %v1869_v51 = vpop.permute.xlu0 %1868 }
0x14a0   :  { %v1871_v50 = vmul.f32 %v2836_v31, %v1869_v51 }
0x14a2   :  { %1873 = vrot.lane.b32.xlu1 %v1871_v50, %s2889_s26 }
0x14a3   :  { %v1845_v52 = vpop.permute.xlu0 %1844 }
0x14a4   :  { %v1847_v53 = vmul.f32 %v2838_v1, %v1845_v52 }
0x14a6   :  { %1849 = vrot.lane.b32.xlu1 %v1847_v53, %s2889_s26 }
0x1514   :  { %v1874_v3 = vpop.permute.xlu1 %1873 }
0x1515   :  { %v1876_v55 = vadd.f32 %v1874_v3, %v1866_v54 }
0x1517   :  { %2839 = vtanh.f32 %v1876_v55 }
0x1518   :  { %v1850_v57 = vpop.permute.xlu1 %1849 }
0x1519   :  { %v1852_v58 = vadd.f32 %v1850_v57, %v1842_v56 }
0x151b   :  { %2841 = vtanh.f32 %v1852_v58 }
0x1521   :  { %v2840_v16 = vpop.eup %2839 }
0x1522   :  { %1879 = vrot.lane.b32.xlu0 %v2840_v16, %s2888_s2 }
0x1525   :  { %v2842_v59 = vpop.eup %2841 }
0x1526   :  { %1855 = vrot.lane.b32.xlu0 %v2842_v59, %s2888_s2 }
0x152a   :  { %1920 = vrot.lane.b32.xlu0 %v1903_v60, %s2889_s26 }
0x1594   :  { %v1880_v63 = vpop.permute.xlu0 %1879 }
0x1595   :  { %v1882_v0 = vmul.f32 %v2836_v31, %v1880_v63  ;;  %v2890_v31 = vmov 0  }
0x1596   :  { %2713 = vset.pattern.permute.xlu1 %v2890_v31  ;;  %2712 = vset.pattern.permute.xlu0 %v2890_v31 }
0x1597   :  { %1890 = vrot.lane.b32.xlu1 %v1882_v0, %s2889_s26 }
0x1598   :  { %v1856_v6 = vpop.permute.xlu0 %1855 }
0x1599   :  { %v1858_v5 = vmul.f32 %v2838_v1, %v1856_v6  ;;  %v2089_v1 = vstv %s3424_s6  ;;  %s2891_s6 = smov [#allocation7]  }
0x159a   :  { %s2235_s25 = sshll.u32 %s2891_s6, 4  ;;  %s2236_s25 = int_to_ptr.vmem [resolvable:$true] %s2235_s25 }
0x159b   :  { %1884 = vrot.lane.b32.xlu0 %v1858_v5, %s2889_s26  ;;  %s2861_s2 = scalar_lea.vmem %s2236_s25, 128  ;;  %p2866_p1 = scmp.lt.s32.totalorder %s2236_s25, %s2236_s25 }
0x159c   :  { %v1921_v15 = vpop.permute.xlu0 %1920  ;;  %p2862_p0 = scmp.ne.s32.totalorder %s2236_s25, %s2861_s2  ;;  %p2867_p2 = scmp.lt.s32.totalorder %s2861_s2, %s2861_s2 }
0x159d   :  { %v3334_v36 = vsel %vm219_vm3, %v1895_v34, %v1921_v15 }
0x159e   :  { %p2868_p3 = por %p2867_p2, %p2866_p1 }
0x159f   :  { %1926 = vrot.lane.b32.xlu0 %v1906_v19, %s2889_s26 }
0x15a0   :  { %p2869_p4 = pnand %p2868_p3, %p2862_p0 }
0x15a3   :  { %1930 = vrot.lane.b32.xlu0 %v1908_v10, %s2889_s26 }
0x1609   :  { %v1891_v17 = vpop.permute.xlu1 %1890 }
0x160a   :  { %1893 = vst.msk [vmem:[#allocation5] sm:$0xff] %vm219_vm3, %v1891_v17 }
0x160d   :  { %v1885_v18 = vpop.permute.xlu0 %1884 }
0x160e   :  { %1888 = vst.msk [vmem:[#allocation4 + $0x38] sm:$0xff] %vm219_vm3, %v1885_v18 }
0x1611   :  { %v1902_v20 = vld [vmem:[#allocation5] sm:$0xff]  ;;  %v1927_v37 = vpop.permute.xlu0 %1926 }
0x1612   :  { %1918 = vrot.lane.b32.xlu1 %v1902_v20, %s2889_s26  ;;  %v3349_v43 = vsel %vm219_vm3, %v1898_v41, %v1927_v37 }
0x1615   :  { %v1931_v44 = vpop.permute.xlu0 %1930  ;;  %v1901_v49 = vld [vmem:[#allocation4 + $0x38] sm:$0xff] }
0x1616   :  { %1922 = vrot.lane.b32.xlu1 %v1904_v24, %s2889_s26  ;;  %v3359_v38 = vsel %vm219_vm3, %v1900_v48, %v1931_v44 }
0x161a   :  { %1924 = vrot.lane.b32.xlu1 %v1905_v23, %s2889_s26 }
0x161e   :  { %1928 = vrot.lane.b32.xlu1 %v1907_v25, %s2889_s26 }
0x1622   :  { %1932 = vrot.lane.b32.xlu1 %v1909_v27, %s2889_s26 }
0x1684   :  { %v1919_v32 = vpop.permute.xlu1 %1918 }
0x1685   :  { %v3331_v35 = vsel %vm219_vm3, %v1894_v33, %v1919_v32 }
0x1686   :  { %2579 = vmatprep.mubr.msk.f32.mxu0 %vm1958_vm4, %v3331_v35 }
0x1687   :  { %2580 = vmatmul.mubr.msk.f32.vlgmr.msra.gmra.mrb[22].mxu0 %vm1958_vm4, %v3334_v36 }
0x1688   :  { %v1923_v61 = vpop.permute.xlu1 %1922 }
0x1689   :  { %v3341_v39 = vsel %vm219_vm3, %v1896_v29, %v1923_v61 }
0x168a   :  { %2582 = vmatprep.mubr.msk.f32.mxu0 %vm1958_vm4, %v3341_v39 }
0x168c   :  { %v1925_v22 = vpop.permute.xlu1 %1924 }
0x168d   :  { %v3346_v42 = vsel %vm219_vm3, %v1897_v40, %v1925_v22 }
0x168e   :  { %2583 = vmatmul.mubr.msk.f32.gmra.mrb[24].mxu0 %vm1958_vm4, %v3346_v42 }
0x168f   :  { %2585 = vmatprep.mubr.msk.f32.mxu0 %vm1958_vm4, %v3349_v43 }
0x1690   :  { %v1929_v46 = vpop.permute.xlu1 %1928 }
0x1691   :  { %v3356_v26 = vsel %vm219_vm3, %v1899_v45, %v1929_v46 }
0x1692   :  { %2586 = vmatmul.mubr.msk.f32.gmra.mrb[26].mxu0 %vm1958_vm4, %v3356_v26 }
0x1693   :  { %2588 = vmatprep.mubr.msk.f32.mxu0 %vm1958_vm4, %v3359_v38 }
0x1694   :  { %v1933_v47 = vpop.permute.xlu1 %1932 }
0x1695   :  { %v3366_v30 = vsel %vm219_vm3, %v1901_v49, %v1933_v47 }
0x1696   :  { %2589 = vmatmul.mubr.msk.f32.gmra.mrb[28].mxu0 %vm1958_vm4, %v3366_v30 }
0x175a   :  { %v2581_v51 = vpop.f32.mrb[22].mxu0 }
0x175b   :  { %v2049_v50 = vpop.f32.mrb[23].mxu0  ;;  %v2091_v54 = vadd.f32 %v2581_v51, %v2089_v1 }
0x175c   :  { %v2090_v3 = vadd.f32 %v2089_v1, %v2049_v50 }
0x175d   :  { %v2100_v16 = vsel %vm2098_vm5, %v2091_v54, -inf }
0x175e   :  { %v2099_v63 = vsel %vm2098_vm5, %v2090_v3, -inf }
0x1761   :  { %v2584_v52 = vpop.f32.mrb[24].mxu0 }
0x1762   :  { %v2059_v53 = vpop.f32.mrb[25].mxu0  ;;  %v2093_v59 = vadd.f32 %v2584_v52, %v2089_v1 }
0x1763   :  { %v2092_v0 = vadd.f32 %v2089_v1, %v2059_v53 }
0x1764   :  { %v2102_v4 = vsel %vm2098_vm5, %v2093_v59, -inf }
0x1765   :  { %v2587_v55 = vpop.f32.mrb[26].mxu0  ;;  %v2101_v28 = vsel %vm2098_vm5, %v2092_v0, -inf }
0x1766   :  { %v2095_v56 = vadd.f32 %v2587_v55, %v2089_v1  ;;  %v2069_v57 = vpop.f32.mrb[27].mxu0 }
0x1767   :  { %v2094_v58 = vadd.f32 %v2089_v1, %v2069_v57 }
0x1768   :  { %v2105_v60 = vsel %vm2098_vm5, %v2095_v56, -inf }
0x1769   :  { %v2106_v6 = vmax.f32 %v2100_v16, %v2105_v60  ;;  %v2103_v5 = vsel %vm2098_vm5, %v2094_v58, -inf  ;;  %v2590_v19 = vpop.f32.mrb[28].mxu0 }
0x176a   :  { %v2104_v10 = vmax.f32 %v2099_v63, %v2103_v5  ;;  %v2097_v2 = vadd.f32 %v2590_v19, %v2089_v1  ;;  %v2079_v12 = vpop.f32.mrb[29].mxu0 }
0x176b   :  { %v2096_v21 = vadd.f32 %v2089_v1, %v2079_v12 }
0x176c   :  { %v2111_v7 = vmax.f32 %v2104_v10, %v2106_v6  ;;  %v2109_v8 = vsel %vm2098_vm5, %v2097_v2, -inf }
0x176d   :  { %v2110_v9 = vmax.f32 %v2102_v4, %v2109_v8  ;;  %v2107_v62 = vsel %vm2098_vm5, %v2096_v21, -inf }
0x176e   :  { %v2108_v11 = vmax.f32 %v2101_v28, %v2107_v62 }
0x1770   :  { %v2112_v13 = vmax.f32 %v2108_v11, %v2110_v9 }
0x1772   :  { %v2113_v14 = vmax.f32 %v2111_v7, %v2112_v13 }
0x1774   :  { %v2114_v15 = vsub.f32 %v2090_v3, %v2113_v14  ;;  %v2116_v17 = vsub.f32 %v2092_v0, %v2113_v14  ;;  %v2117_v18 = vsub.f32 %v2093_v59, %v2113_v14  ;;  %v2118_v20 = vsub.f32 %v2094_v58, %v2113_v14 }
0x1775   :  { %v2119_v24 = vsub.f32 %v2095_v56, %v2113_v14  ;;  %v2120_v23 = vsub.f32 %v2096_v21, %v2113_v14  ;;  %v2121_v25 = vsub.f32 %v2097_v2, %v2113_v14  ;;  %v2115_v27 = vsub.f32 %v2091_v54, %v2113_v14 }
0x1776   :  { %v2126_v32 = vmul.f32 1.442695, %v2116_v17  ;;  %v2122_v33 = vmul.f32 1.442695, %v2114_v15  ;;  %v2128_v29 = vmul.f32 1.442695, %v2117_v18 }
0x1777   :  { %v2124_v34 = vmul.f32 1.442695, %v2115_v27  ;;  %v2130_v61 = vmul.f32 1.442695, %v2118_v20  ;;  %v2132_v37 = vmul.f32 1.442695, %v2119_v24 }
0x1778   :  { %2843 = vpow2.f32 %v2126_v32  ;;  %v2134_v40 = vmul.f32 1.442695, %v2120_v23  ;;  %v2136_v22 = vmul.f32 1.442695, %v2121_v25 }
0x1779   :  { %2845 = vpow2.f32 %v2122_v33 }
0x177a   :  { %2847 = vpow2.f32 %v2124_v34 }
0x177b   :  { %2849 = vpow2.f32 %v2128_v29 }
0x177c   :  { %2851 = vpow2.f32 %v2130_v61 }
0x177d   :  { %2853 = vpow2.f32 %v2132_v37 }
0x177e   :  { %2855 = vpow2.f32 %v2134_v40 }
0x177f   :  { %2857 = vpow2.f32 %v2136_v22 }
0x1782   :  { %v2844_v41 = vpop.eup %2843 }
0x1783   :  { %v2846_v44 = vpop.eup %2845  ;;  %v2141_v31 = vsel %vm2098_vm5, %v2844_v41, 0.0 }
0x1784   :  { %v2848_v45 = vpop.eup %2847  ;;  %v2138_v46 = vsel %vm2098_vm5, %v2846_v44, 0.0 }
0x1785   :  { %v2139_v48 = vsel %vm2098_vm5, %v2848_v45, 0.0  ;;  %v2850_v47 = vpop.eup %2849 }
0x1786   :  { %v2140_v49 = vadd.f32 %v2139_v48, %v2138_v46  ;;  %v2852_v51 = vpop.eup %2851  ;;  %v2143_v1 = vsel %vm2098_vm5, %v2850_v47, 0.0 }
0x1787   :  { %v2854_v52 = vpop.eup %2853  ;;  %v2145_v54 = vsel %vm2098_vm5, %v2852_v51, 0.0 }
0x1788   :  { %v2142_v50 = vadd.f32 %v2141_v31, %v2140_v49  ;;  %v2856_v3 = vpop.eup %2855  ;;  %v2147_v56 = vsel %vm2098_vm5, %v2854_v52, 0.0 }
0x1789   :  { %v2858_v57 = vpop.eup %2857  ;;  %v2149_v16 = vsel %vm2098_vm5, %v2856_v3, 0.0 }
0x178a   :  { %v2144_v53 = vadd.f32 %v2143_v1, %v2142_v50  ;;  %v2151_v60 = vsel %vm2098_vm5, %v2858_v57, 0.0 }
0x178c   :  { %v2146_v55 = vadd.f32 %v2145_v54, %v2144_v53 }
0x178e   :  { %v2148_v58 = vadd.f32 %v2147_v56, %v2146_v55 }
0x1790   :  { %v2150_v59 = vadd.f32 %v2149_v16, %v2148_v58 }
0x1792   :  { %v2152_v63 = vadd.f32 %v2151_v60, %v2150_v59 }
0x1794   :  { %2859 = vrcp.f32 %v2152_v63 }
0x179e   :  { %v2860_v0 = vpop.eup %2859 }
0x179f   :  { %v2155_v6 = vmul.f32 %v2860_v0, %v2848_v45  ;;  %v2154_v5 = vmul.f32 %v2860_v0, %v2846_v44  ;;  %v2156_v19 = vmul.f32 %v2860_v0, %v2844_v41  ;;  %v2157_v10 = vmul.f32 %v2860_v0, %v2850_v47 }
0x17a0   :  { %v2158_v2 = vmul.f32 %v2860_v0, %v2852_v51  ;;  %v2159_v12 = vmul.f32 %v2860_v0, %v2854_v52  ;;  %v2160_v21 = vmul.f32 %v2860_v0, %v2856_v3  ;;  %v2161_v4 = vmul.f32 %v2860_v0, %v2858_v57 }
0x17a1   :  { %2169 = vperm.xlu1 %2713, %v2155_v6   ;;  %2164 = vperm.xlu0 %2712, %v2154_v5  }
0x17a5   :  { %2174 = vperm.xlu1 %2713, %v2156_v19   ;;  %2179 = vperm.xlu0 %2712, %v2157_v10  }
0x17a9   :  { %2184 = vperm.xlu1 %2713, %v2158_v2   ;;  %2189 = vperm.xlu0 %2712, %v2159_v12  }
0x17ad   :  { %2194 = vperm.xlu1 %2713, %v2160_v21   ;;  %2199 = vperm.xlu0 %2712, %v2161_v4  }
0x1820   :  { %v2170_v7 = vpop.permute.xlu1 %2169  ;;  %v2165_v8 = vpop.permute.xlu0 %2164 }
0x1821   :  { %v2203_v28 = vmul.f32 %v2170_v7, %v3334_v36  ;;  %v2202_v9 = vmul.f32 %v2165_v8, %v3331_v35 }
0x1823   :  { %v2211_v62 = vsel %vm1958_vm4, %v2203_v28, 0.0  ;;  %v2210_v11 = vsel %vm1958_vm4, %v2202_v9, 0.0 }
0x1824   :  { %v2175_v13 = vpop.permute.xlu1 %2174  ;;  %v2180_v14 = vpop.permute.xlu0 %2179  ;;  %v2212_v18 = vadd.f32 %v2211_v62, %v2210_v11 }
0x1825   :  { %v2204_v15 = vmul.f32 %v2175_v13, %v3341_v39  ;;  %v2205_v17 = vmul.f32 %v2180_v14, %v3346_v42 }
0x1827   :  { %v2213_v20 = vsel %vm1958_vm4, %v2204_v15, 0.0  ;;  %v2215_v36 = vsel %vm1958_vm4, %v2205_v17, 0.0 }
0x1828   :  { %v2214_v24 = vadd.f32 %v2213_v20, %v2212_v18  ;;  %v2185_v23 = vpop.permute.xlu1 %2184  ;;  %v2190_v25 = vpop.permute.xlu0 %2189 }
0x1829   :  { %v2206_v35 = vmul.f32 %v2185_v23, %v3349_v43  ;;  %v2207_v27 = vmul.f32 %v2190_v25, %v3356_v26 }
0x182a   :  { %v2216_v32 = vadd.f32 %v2215_v36, %v2214_v24 }
0x182b   :  { %v2217_v33 = vsel %vm1958_vm4, %v2206_v35, 0.0  ;;  %v2219_v42 = vsel %vm1958_vm4, %v2207_v27, 0.0 }
0x182c   :  { %v2218_v34 = vadd.f32 %v2217_v33, %v2216_v32  ;;  %v2195_v29 = vpop.permute.xlu1 %2194  ;;  %v2200_v39 = vpop.permute.xlu0 %2199 }
0x182d   :  { %v2208_v61 = vmul.f32 %v2195_v29, %v3359_v38  ;;  %v2209_v37 = vmul.f32 %v2200_v39, %v3366_v30 }
0x182e   :  { %v2220_v40 = vadd.f32 %v2219_v42, %v2218_v34 }
0x182f   :  { %v2221_v22 = vsel %vm1958_vm4, %v2208_v61, 0.0  ;;  %v2223_v43 = vsel %vm1958_vm4, %v2209_v37, 0.0 }
0x1830   :  { %v2222_v41 = vadd.f32 %v2221_v22, %v2220_v40 }
0x1832   :  { %v2224_v44 = vadd.f32 %v2223_v43, %v2222_v41 }
0x1834   :  { %vm2225_vm6 = vcmp.ge.f32.partialorder %v2224_v44, 0.0  ;;  %v2226_v26 = vmul.f32 0.1, %v2224_v44 }
0x1836   :  { %v2227_v45 = vsel %vm2225_vm6, %v2224_v44, %v2226_v26 }
0x1837   :  { %2228 = vst.msk [vmem:[#allocation7] sm:$0xff] %vm1958_vm4, %v2227_v45 }
0x1838   :  { %2872 = shalt.err (!%p2869_p4)
}
0x1839   :  { %s2873_s28 = scalar_lea.hbm %s3425_s7, 128 }
0x183a   :  { %p2874_p5 = scmp.ne.s32.totalorder %s3425_s7, %s2873_s28  ;;  %p2877_p6 = scmp.lt.u32.totalorder %s2873_s28, %s3425_s7 }
0x183c   :  { %p2879_p7 = pnand %p2877_p6, %p2874_p5 }
0x183e   :  { %2882 = shalt.err (!%p2879_p7)
}
0x183f   :  { %2238 = dma.vmem_to_hbm [thread:$0]  %s2236_s25, 128, %s3425_s7, [#allocation8]  }
0x1840   :  { %2883 = dma.done.wait [#allocation8], 128  }
0x1841   :  { %2884 = vsyncadd [#allocation8], 4294967168 }
0x1842   :  { %2242 = vsyncpa [#allocation8], 1 }

</bundles_post_ra>
